<compile_context>
chip_gen: v6e
topology: v6e:2x2x1
jax: 0.10.0
libtpu: 0.0.40
codegen_flags: <defaults>
</compile_context>

<pallas_src>
import functools

import jax
import jax.numpy as jnp
from jax.experimental import pallas as pl
from jax.experimental.pallas import tpu as pltpu

D = 768            # embedding_dim of Linear4HEAD
HEADS_PAD = 128    # sent(2) + clas(2) + topic(10) = 14 cols, padded lane-dense to 128
SUBLANE = 16       # bf16 sublane packing for the x tile


def _round_up(x, m):
    return ((x + m - 1) // m) * m


def _tpu_generation(default=6):
    """Best-effort TPU generation from device_kind (5 = v5e, 6 = v6e, 7 = v7x)."""
    try:
        kind = jax.devices()[0].device_kind.lower()
    except Exception:
        return default
    for g in (7, 6, 5, 4):
        if f"v{g}" in kind or f"tpu{g}" in kind:
            return g
    return default


def linear4head_kernel(x_ref, w1_ref, small_ref, wh_ref, out_ref, *,
                       bf16_elementwise):
    """Fused: fc_input -> SiLU -> LayerNorm -> [out_sent | out_clas | out_topic]."""
    # Packed small params: row 0 = fc_input bias, 1 = ln gamma, 2 = ln beta,
    # row 3 lanes [0:128] = fused head bias (zero-padded).
    b1 = small_ref[0:1, :]                       # [1, D] f32
    gamma = small_ref[1:2, :]                    # [1, D] f32
    beta = small_ref[2:3, :]                     # [1, D] f32
    bh = small_ref[3:4, 0:HEADS_PAD]             # [1, 128] f32

    # fc_input: bf16 x / bf16 W on the MXU, f32 accumulation; bias add in f32.
    h = jnp.dot(x_ref[...], w1_ref[...], preferred_element_type=jnp.float32) + b1

    # SiLU: sigmoid goes to the EUP slot; the multiply stays on the VPU (f32
    # so the LayerNorm statistics below see full-precision activations).
    h = h * jax.nn.sigmoid(h)

    # LayerNorm statistics in f32, two-pass (mu, then E[(h-mu)^2]) to avoid
    # the E[h^2]-mu^2 cancellation flagged in review.  eps=1e-5, biased var.
    mu = jnp.mean(h, axis=-1, keepdims=True)
    d = h - mu
    var = jnp.mean(d * d, axis=-1, keepdims=True)
    rstd = jax.lax.rsqrt(var + 1e-5)

    if bf16_elementwise:
        # v6e/v7x: normalize + affine in packed bf16 vregs (halves the VALU
        # work on the binding slot) and lands h directly in bf16 for the MXU.
        hn = (d.astype(jnp.bfloat16) * rstd.astype(jnp.bfloat16)
              * gamma.astype(jnp.bfloat16) + beta.astype(jnp.bfloat16))
    else:
        # v5e: no bf16 VALU -> keep elementwise math in f32, single final cast.
        hn = (d * rstd * gamma + beta).astype(jnp.bfloat16)

    # Three output heads fused into one lane-dense [D, 128] matmul.
    out = jnp.dot(hn, wh_ref[...], preferred_element_type=jnp.float32)
    out_ref[...] = out + bh


def linear4head_pallas(encoded, params, tb=1024):
    """encoded: [B, 768] (bf16 preferred) -> (sent [B,2], clas [B,2], topic [B,10])."""
    B = encoded.shape[0]
    gen = _tpu_generation()

    # The x stream dominates HBM traffic -> feed it to the kernel in bf16.
    # Ideally the producer already emits bf16 (as in __main__); the astype
    # below is only a fallback for f32 callers.
    if encoded.dtype != jnp.bfloat16:
        encoded = encoded.astype(jnp.bfloat16)

    # Batch tile: large (512-1024) to amortize the ~0.35us per-grid-step
    # overhead, multiple of 16 for bf16 sublane packing.  On v7x cap it so the
    # grid keeps >=2 tiles and dimension_semantics=("parallel",) can shard the
    # batch across both TensorCores.
    TB = min(tb, _round_up(B, SUBLANE))
    if gen >= 7:
        TB = min(TB, max(SUBLANE, _round_up(pl.cdiv(B, 2), SUBLANE)))
    TB = max(SUBLANE, (TB // SUBLANE) * SUBLANE)
    BP = _round_up(B, TB)
    if BP != B:
        encoded = jnp.pad(encoded, ((0, BP - B), (0, 0)))
    grid = (BP // TB,)

    w1 = params["w1"]          # [D, D]        bf16  (fc_input.weight^T)
    wh = params["wh"]          # [D, 128]      bf16  (fused head weights)
    small = params["small"]    # [4, D]        f32   (b1 | ln_g | ln_b | head bias)

    # Generation-aware VMEM budget: double-buffered x/out tiles + resident
    # weights + f32/bf16 intermediates, with 1.5x headroom (never the full
    # 64 MiB of a v7x TC; at least the 16 MiB default scoped limit).
    tile_bytes = (2 * TB * D * 2                                   # x, bf16, 2 bufs
                  + 2 * TB * HEADS_PAD * 4                         # out, f32, 2 bufs
                  + 2 * (D * D * 2 + D * HEADS_PAD * 2 + 4 * D * 4)  # weights
                  + TB * D * (4 + 4 + 2))                          # h, d, bf16 temp
    vmem_limit = int(min(60 * 1024 * 1024,
                         max(16 * 1024 * 1024, tile_bytes * 3 // 2)))

    flops = 2 * BP * D * D + 2 * BP * D * HEADS_PAD
    bytes_accessed = (encoded.size * 2 + w1.size * 2 + wh.size * 2
                      + small.size * 4 + BP * HEADS_PAD * 4)
    cost = pl.CostEstimate(flops=flops, transcendentals=BP * D,
                           bytes_accessed=bytes_accessed)

    # bf16 elementwise normalize only where the VPU has bf16 lanes (v6e/v7x).
    kernel = functools.partial(linear4head_kernel,
                               bf16_elementwise=(gen >= 6))

    out = pl.pallas_call(
        kernel,
        out_shape=jax.ShapeDtypeStruct((BP, HEADS_PAD), jnp.float32),
        grid=grid,
        in_specs=[
            pl.BlockSpec((TB, D), lambda i: (i, 0)),          # x: tiled over batch
            pl.BlockSpec((D, D), lambda i: (0, 0)),           # w1: VMEM-resident
            pl.BlockSpec((4, D), lambda i: (0, 0)),           # packed small params
            pl.BlockSpec((D, HEADS_PAD), lambda i: (0, 0)),   # fused head weights
        ],
        out_specs=pl.BlockSpec((TB, HEADS_PAD), lambda i: (i, 0)),
        compiler_params=pltpu.CompilerParams(
            dimension_semantics=("parallel",),     # v7x: batch tiles across 2 TCs
            vmem_limit_bytes=vmem_limit,
        ),
        cost_estimate=cost,
    )(encoded, w1, small, wh)

    sent = out[:B, 0:2]
    clas = out[:B, 2:4]
    topic = out[:B, 4:14]
    return sent, clas, topic


def make_params(key):
    """Deterministic synthetic parameters with the module's shapes."""
    ks = jax.random.split(key, 8)
    scale = 1.0 / jnp.sqrt(jnp.float32(D))
    w1 = jax.random.normal(ks[0], (D, D), jnp.float32) * scale          # fc_input.weight^T
    b1 = jax.random.normal(ks[1], (D,), jnp.float32) * scale            # fc_input.bias
    ln1_g = jnp.ones((D,), jnp.float32)                                 # ln1.weight
    ln1_b = jnp.zeros((D,), jnp.float32)                                # ln1.bias

    w_sent = jax.random.normal(ks[2], (D, 2), jnp.float32) * scale
    b_sent = jax.random.normal(ks[3], (2,), jnp.float32) * scale
    w_clas = jax.random.normal(ks[4], (D, 2), jnp.float32) * scale
    b_clas = jax.random.normal(ks[5], (2,), jnp.float32) * scale
    w_topic = jax.random.normal(ks[6], (D, 10), jnp.float32) * scale
    b_topic = jax.random.normal(ks[7], (10,), jnp.float32) * scale

    # Fuse the three heads into one [D, 128] weight (zero-padded columns).
    wh = jnp.zeros((D, HEADS_PAD), jnp.float32)
    wh = wh.at[:, 0:2].set(w_sent).at[:, 2:4].set(w_clas).at[:, 4:14].set(w_topic)
    bh = jnp.zeros((D,), jnp.float32)
    bh = bh.at[0:2].set(b_sent).at[2:4].set(b_clas).at[4:14].set(b_topic)

    # Pack the four small vectors into one (4, D) f32 tensor -> a single DMA.
    small = jnp.stack([b1, ln1_g, ln1_b, bh], axis=0)

    return {
        "w1": w1.astype(jnp.bfloat16),
        "wh": wh.astype(jnp.bfloat16),
        "small": small,
    }


def reference_head(encoded, p):
    """Pure-JAX reference matching the module semantics (bf16 MXU operands,
    f32 accumulation / LayerNorm, same precision contract as the kernel)."""
    b1 = p["small"][0:1, :]
    gamma = p["small"][1:2, :]
    beta = p["small"][2:3, :]
    bh = p["small"][3:4, 0:HEADS_PAD]
    h = jnp.dot(encoded.astype(jnp.bfloat16), p["w1"],
                preferred_element_type=jnp.float32) + b1
    h = h * jax.nn.sigmoid(h)
    mu = jnp.mean(h, axis=-1, keepdims=True)
    var = jnp.mean((h - mu) ** 2, axis=-1, keepdims=True)
    h = (h - mu) / jnp.sqrt(var + 1e-5) * gamma + beta
    out = jnp.dot(h.astype(jnp.bfloat16), p["wh"],
                  preferred_element_type=jnp.float32) + bh
    return out[:, 0:2], out[:, 2:4], out[:, 4:14]


if __name__ == "__main__":
    key = jax.random.PRNGKey(0)
    k_tok, k_emb, k_par = jax.random.split(key, 3)

    B, S, VOCAB = 8, 8, 1000
    sentences = jax.random.randint(k_tok, (B, S), 0, VOCAB, dtype=jnp.int32)
    attention = jnp.ones((B, S), dtype=jnp.int32)  # unused by the stand-in encoder

    # Stand-in for BertModel(...).last_hidden_state[:, 0, :]:
    # deterministic embedding lookup of the CLS-position token.  The producer
    # emits bf16 so the kernel's x stream is already half-width.
    emb_table = (jax.random.normal(k_emb, (VOCAB, D), jnp.float32) * 0.02
                 ).astype(jnp.bfloat16)
    encoded = emb_table[sentences[:, 0]]            # [B, 768] bf16

    params = make_params(k_par)

    sent, clas, topic = linear4head_pallas(encoded, params)
    jax.block_until_ready((sent, clas, topic))

    # Sanity check against a pure-JAX reference (same bf16-operand precision).
    r_sent, r_clas, r_topic = reference_head(encoded, params)
    assert jnp.allclose(sent, r_sent, atol=1e-2, rtol=5e-2)
    assert jnp.allclose(clas, r_clas, atol=1e-2, rtol=5e-2)
    assert jnp.allclose(topic, r_topic, atol=1e-2, rtol=5e-2)
    assert sent.shape == (B, 2) and clas.shape == (B, 2) and topic.shape == (B, 10)

    print("KERNEL_OK")
</pallas_src>

<mosaic_0001>
module attributes {stable_mosaic.version = 11 : i64} {
  func.func @linear4head_kernel(%arg0: i32, %arg1: memref<16x768xbf16, #tpu.memory_space<vmem>>, %arg2: memref<768x768xbf16, #tpu.memory_space<vmem>>, %arg3: memref<4x768xf32, #tpu.memory_space<vmem>>, %arg4: memref<768x128xbf16, #tpu.memory_space<vmem>>, %arg5: memref<16x128xf32, #tpu.memory_space<vmem>>) attributes {dimension_semantics = [#tpu.dimension_semantics<parallel>], iteration_bounds = array<i64: 1>, scalar_prefetch = 0 : i64, scratch_operands = 0 : i64, tpu.core_type = #tpu.core_type<tc>, window_params = [{transform_indices = @transform_0, window_bounds = array<i64: 16, 768>}, {pipeline_mode = #tpu.pipeline_mode<synchronous>, transform_indices = @transform_1, window_bounds = array<i64: 768, 768>}, {pipeline_mode = #tpu.pipeline_mode<synchronous>, transform_indices = @transform_2, window_bounds = array<i64: 4, 768>}, {pipeline_mode = #tpu.pipeline_mode<synchronous>, transform_indices = @transform_3, window_bounds = array<i64: 768, 128>}, {transform_indices = @transform_4, window_bounds = array<i64: 16, 128>}]} {
    %c0 = arith.constant 0 : index
    %c0_0 = arith.constant 0 : index
    %0 = vector.load %arg3[%c0, %c0_0] : memref<4x768xf32, #tpu.memory_space<vmem>>, vector<1x768xf32>
    %c1 = arith.constant 1 : index
    %c0_1 = arith.constant 0 : index
    %1 = vector.load %arg3[%c1, %c0_1] : memref<4x768xf32, #tpu.memory_space<vmem>>, vector<1x768xf32>
    %c2 = arith.constant 2 : index
    %c0_2 = arith.constant 0 : index
    %2 = vector.load %arg3[%c2, %c0_2] : memref<4x768xf32, #tpu.memory_space<vmem>>, vector<1x768xf32>
    %c3 = arith.constant 3 : index
    %c0_3 = arith.constant 0 : index
    %3 = vector.load %arg3[%c3, %c0_3] : memref<4x768xf32, #tpu.memory_space<vmem>>, vector<1x128xf32>
    %c0_4 = arith.constant 0 : index
    %c0_5 = arith.constant 0 : index
    %4 = vector.load %arg1[%c0_4, %c0_5] : memref<16x768xbf16, #tpu.memory_space<vmem>>, vector<16x768xbf16>
    %c0_6 = arith.constant 0 : index
    %c0_7 = arith.constant 0 : index
    %5 = vector.load %arg2[%c0_6, %c0_7] : memref<768x768xbf16, #tpu.memory_space<vmem>>, vector<768x768xbf16>
    %cst = arith.constant dense<0.000000e+00> : vector<16x768xf32>
    %6 = tpu.matmul %4, %5, %cst {dimension_numbers = #tpu.dot_dimension_numbers<[1], [0], [0], [1], [0, 0, 1, 1], [], []>} : vector<16x768xbf16>, vector<768x768xbf16>, vector<16x768xf32> -> vector<16x768xf32>
    %7 = vector.broadcast %0 : vector<1x768xf32> to vector<16x768xf32>
    %8 = arith.addf %6, %7 : vector<16x768xf32>
    %9 = arith.negf %8 : vector<16x768xf32>
    %10 = math.exp %9 : vector<16x768xf32>
    %cst_8 = arith.constant 1.000000e+00 : f32
    %11 = vector.broadcast %cst_8 : f32 to vector<16x768xf32>
    %12 = arith.addf %11, %10 : vector<16x768xf32>
    %13 = arith.divf %11, %12 : vector<16x768xf32>
    %14 = arith.mulf %8, %13 : vector<16x768xf32>
    %cst_9 = arith.constant dense<0.000000e+00> : vector<16xf32>
    %15 = vector.multi_reduction <add>, %14, %cst_9 [1] : vector<16x768xf32> to vector<16xf32>
    %16 = vector.shape_cast %15 : vector<16xf32> to vector<16x1xf32>
    %cst_10 = arith.constant 7.680000e+02 : f32
    %17 = vector.broadcast %cst_10 : f32 to vector<16x1xf32>
    %18 = arith.divf %16, %17 : vector<16x1xf32>
    %19 = vector.broadcast %18 : vector<16x1xf32> to vector<16x768xf32>
    %20 = arith.subf %14, %19 : vector<16x768xf32>
    %21 = arith.mulf %20, %20 : vector<16x768xf32>
    %cst_11 = arith.constant dense<0.000000e+00> : vector<16xf32>
    %22 = vector.multi_reduction <add>, %21, %cst_11 [1] : vector<16x768xf32> to vector<16xf32>
    %23 = vector.shape_cast %22 : vector<16xf32> to vector<16x1xf32>
    %cst_12 = arith.constant 7.680000e+02 : f32
    %24 = vector.broadcast %cst_12 : f32 to vector<16x1xf32>
    %25 = arith.divf %23, %24 : vector<16x1xf32>
    %cst_13 = arith.constant 9.99999974E-6 : f32
    %26 = vector.broadcast %cst_13 : f32 to vector<16x1xf32>
    %27 = arith.addf %25, %26 : vector<16x1xf32>
    %28 = math.rsqrt %27 : vector<16x1xf32>
    %29 = arith.truncf %20 : vector<16x768xf32> to vector<16x768xbf16>
    %30 = arith.truncf %28 : vector<16x1xf32> to vector<16x1xbf16>
    %31 = vector.broadcast %30 : vector<16x1xbf16> to vector<16x768xbf16>
    %32 = arith.mulf %29, %31 : vector<16x768xbf16>
    %33 = arith.truncf %1 : vector<1x768xf32> to vector<1x768xbf16>
    %34 = vector.broadcast %33 : vector<1x768xbf16> to vector<16x768xbf16>
    %35 = arith.mulf %32, %34 : vector<16x768xbf16>
    %36 = arith.truncf %2 : vector<1x768xf32> to vector<1x768xbf16>
    %37 = vector.broadcast %36 : vector<1x768xbf16> to vector<16x768xbf16>
    %38 = arith.addf %35, %37 : vector<16x768xbf16>
    %c0_14 = arith.constant 0 : index
    %c0_15 = arith.constant 0 : index
    %39 = vector.load %arg4[%c0_14, %c0_15] : memref<768x128xbf16, #tpu.memory_space<vmem>>, vector<768x128xbf16>
    %cst_16 = arith.constant dense<0.000000e+00> : vector<16x128xf32>
    %40 = tpu.matmul %38, %39, %cst_16 {dimension_numbers = #tpu.dot_dimension_numbers<[1], [0], [0], [1], [0, 0, 1, 1], [], []>} : vector<16x768xbf16>, vector<768x128xbf16>, vector<16x128xf32> -> vector<16x128xf32>
    %41 = vector.broadcast %3 : vector<1x128xf32> to vector<16x128xf32>
    %42 = arith.addf %40, %41 : vector<16x128xf32>
    %c0_17 = arith.constant 0 : index
    %c0_18 = arith.constant 0 : index
    %43 = vector.load %arg5[%c0_17, %c0_18] : memref<16x128xf32, #tpu.memory_space<vmem>>, vector<16x128xf32>
    tpu.vector_store %arg5[%c0_17, %c0_18], %42 {strides = array<i32>} : memref<16x128xf32, #tpu.memory_space<vmem>>, vector<16x128xf32>,
    return
  }
  func.func @transform_0(%arg0: i32) -> (i32, i32) {
    %c0_i32 = arith.constant 0 : i32
    %c0_i32_0 = arith.constant 0 : i32
    return %arg0, %c0_i32 : i32, i32
  }
  func.func @transform_1(%arg0: i32) -> (i32, i32) {
    %c0_i32 = arith.constant 0 : i32
    %c0_i32_0 = arith.constant 0 : i32
    %c0_i32_1 = arith.constant 0 : i32
    return %c0_i32, %c0_i32_0 : i32, i32
  }
  func.func @transform_2(%arg0: i32) -> (i32, i32) {
    %c0_i32 = arith.constant 0 : i32
    %c0_i32_0 = arith.constant 0 : i32
    %c0_i32_1 = arith.constant 0 : i32
    return %c0_i32, %c0_i32_0 : i32, i32
  }
  func.func @transform_3(%arg0: i32) -> (i32, i32) {
    %c0_i32 = arith.constant 0 : i32
    %c0_i32_0 = arith.constant 0 : i32
    %c0_i32_1 = arith.constant 0 : i32
    return %c0_i32, %c0_i32_0 : i32, i32
  }
  func.func @transform_4(%arg0: i32) -> (i32, i32) {
    %c0_i32 = arith.constant 0 : i32
    %c0_i32_0 = arith.constant 0 : i32
    return %arg0, %c0_i32 : i32, i32
  }
}

</mosaic_0001>

<bundles_post_ra>
// kernel: tpu_custom_call.1
= control target key start
LH: loop header
LB: loop body
LE: loop exit
PB: predicated region body
PF: predicated region fallthrough
CT: control target
= control target key end

     0   :  { %9 = vsyncpa [#allocation3], 0  ;;  %s4442_s0 = inlined_call_operand.hbm [shape: bf16[16,768], index: 0, kind: input, shape index: {}]   ;;  %s4443_s1 = inlined_call_operand.hbm [shape: bf16[768,768], index: 1, kind: input, shape index: {}]   ;;  %s4444_s2 = inlined_call_operand.hbm [shape: f32[4,768], index: 2, kind: input, shape index: {}]   ;;  %s4445_s3 = inlined_call_operand.hbm [shape: bf16[768,128], index: 3, kind: input, shape index: {}]   ;;  %s4446_s4 = inlined_call_operand.hbm [shape: f32[16,128], index: 4, kind: output, shape index: {}]  }
   0x1   :  { %10 = vsyncpa [#allocation6], 0 }
   0x2   :  { %11 = vsyncpa [#allocation9], 0 }
   0x3   :  { %12 = vsyncpa [#allocation4], 0  ;;  %s4207_s15 = smov [#allocation5]   ;;  %s4208_s17 = smov [#allocation2]  }
   0x4   :  { %s30_s16 = sshll.u32 %s4207_s15, 4  ;;  %s18_s18 = sshll.u32 %s4208_s17, 4  ;;  %s31_s16 = int_to_ptr.vmem [resolvable:$true] %s30_s16  ;;  %s19_s18 = int_to_ptr.vmem [resolvable:$true] %s18_s18 }
   0x5   :  { %s4107_s19 = scalar_lea.vmem %s31_s16, 36864  ;;  %p4112_p1 = scmp.lt.s32.totalorder %s31_s16, %s31_s16 }
   0x6   :  { %p4108_p0 = scmp.ne.s32.totalorder %s31_s16, %s4107_s19  ;;  %p4113_p2 = scmp.lt.s32.totalorder %s4107_s19, %s4107_s19 }
   0x8   :  { %p4114_p3 = por %p4113_p2, %p4112_p1 }
   0xa   :  { %p4115_p4 = pnand %p4114_p3, %p4108_p0 }
   0xc   :  { %4118 = shalt.err (!%p4115_p4)
}
   0xd   :  { %s4209_s20 = smov 384   ;;  %s4210_s21 = smov 24  }
   0xe   :  { %36 = dma.hbm_to_vmem [thread:$0]  %s4443_s1, 36864, %s31_s16, [#allocation6], %s4209_s20, %s4209_s20, %s4210_s21  }
   0xf   :  { %s4127_s24 = scalar_lea.vmem %s19_s18, 768  ;;  %p4132_p6 = scmp.lt.s32.totalorder %s19_s18, %s19_s18 }
  0x10   :  { %p4128_p5 = scmp.ne.s32.totalorder %s19_s18, %s4127_s24  ;;  %p4133_p7 = scmp.lt.s32.totalorder %s4127_s24, %s4127_s24 }
  0x12   :  { %p4134_p8 = por %p4133_p7, %p4132_p6 }
  0x14   :  { %p4135_p9 = pnand %p4134_p8, %p4128_p5 }
  0x16   :  { %4138 = shalt.err (!%p4135_p9)
}
  0x17   :  { %24 = dma.hbm_to_vmem [thread:$0]  %s4442_s0, 768, %s19_s18, [#allocation3], %s4209_s20, %s4209_s20, %s4210_s21  }
  0x18   :  { %s4211_s27 = smov [#allocation7]   ;;  %s4212_s29 = smov [#allocation8]  }
  0x19   :  { %s43_s28 = sshll.u32 %s4211_s27, 4  ;;  %s52_s30 = sshll.u32 %s4212_s29, 4  ;;  %s44_s28 = int_to_ptr.vmem [resolvable:$true] %s43_s28  ;;  %s53_s30 = int_to_ptr.vmem [resolvable:$true] %s52_s30 }
  0x1a   :  { %s4147_s5 = scalar_lea.vmem %s44_s28, 384  ;;  %p4152_p11 = scmp.lt.s32.totalorder %s44_s28, %s44_s28 }
  0x1b   :  { %p4148_p10 = scmp.ne.s32.totalorder %s44_s28, %s4147_s5  ;;  %p4153_p12 = scmp.lt.s32.totalorder %s4147_s5, %s4147_s5 }
  0x1d   :  { %p4154_p13 = por %p4153_p12, %p4152_p11 }
  0x1f   :  { %p4155_p0 = pnand %p4154_p13, %p4148_p10 }
  0x21   :  { %4158 = shalt.err (!%p4155_p0)
}
  0x22   :  { %46 = dma.hbm_to_vmem [thread:$0]  %s4444_s2, 384, %s44_s28, [#allocation6]  }
  0x23   :  { %s4167_s7 = scalar_lea.vmem %s53_s30, 6144  ;;  %p4172_p2 = scmp.lt.s32.totalorder %s53_s30, %s53_s30 }
  0x24   :  { %p4168_p1 = scmp.ne.s32.totalorder %s53_s30, %s4167_s7  ;;  %p4173_p3 = scmp.lt.s32.totalorder %s4167_s7, %s4167_s7 }
  0x26   :  { %p4174_p4 = por %p4173_p3, %p4172_p2 }
  0x28   :  { %p4175_p5 = pnand %p4174_p4, %p4168_p1 }
  0x2a   :  { %4178 = shalt.err (!%p4175_p5)
}
  0x2b   :  { %s4213_s0 = smov 64   ;;  %s4214_s8 = smov 4  }
  0x2c   :  { %58 = dma.hbm_to_vmem [thread:$0]  %s4445_s3, 6144, %s53_s30, [#allocation9], %s4213_s0, %s4213_s0, %s4214_s8  }
  0x2d   :  { %4199 = dma.done.wait [#allocation3], 768  }
  0x2e   :  { %4200 = vsyncadd [#allocation3], 4294966528 }
  0x2f   :  { %4201 = dma.done.wait [#allocation6], 37248  }
  0x30   :  { %4202 = vsyncadd [#allocation6], 4294930048 }
  0x31   :  { %4203 = dma.done.wait [#allocation9], 6144  }
  0x32   :  { %4204 = vsyncadd [#allocation9], 4294961152  ;;  %v3552_v0 = vld [vmem:[#allocation5 + $0x154] ss:$24 sps:$4 sm:$0xff]   ;;  %v3554_v1 = vld [vmem:[#allocation5 + $0x150] ss:$24 sps:$4 sm:$0xff]  }
  0x33   :  { %1873 = vmatprep.subr.bf16.mxu0 %v3552_v0  ;;  %v3555_v2 = vld [vmem:[#allocation5 + $0x454] ss:$24 sps:$4 sm:$0xff]   ;;  %v3557_v3 = vld [vmem:[#allocation5 + $0x450] ss:$24 sps:$4 sm:$0xff]   ;;  %v3558_v4 = vld [vmem:[#allocation5 + $0x124] ss:$24 sps:$4 sm:$0xff]  }
  0x34   :  { %1874 = vmatpush1.bf16.msra.mxu0 %v3554_v1  ;;  %v3560_v5 = vld [vmem:[#allocation5 + $0x120] ss:$24 sps:$4 sm:$0xff]   ;;  %1916 = vmatprep.subr.bf16.mxu1 %v3555_v2  ;;  %v3561_v6 = vld [vmem:[#allocation5 + $0x424] ss:$24 sps:$4 sm:$0xff]   ;;  %v3564_v8 = vld [vmem:[#allocation5 + $0xf4] ss:$24 sps:$4 sm:$0xff]  }
  0x35   :  { %1917 = vmatpush1.bf16.msra.mxu1 %v3557_v3  ;;  %1875 = vmatprep.subr.bf16.mxu0 %v3558_v4  ;;  %v3563_v7 = vld [vmem:[#allocation5 + $0x420] ss:$24 sps:$4 sm:$0xff]   ;;  %v3566_v9 = vld [vmem:[#allocation5 + $0xf0] ss:$24 sps:$4 sm:$0xff]   ;;  %v3567_v10 = vld [vmem:[#allocation5 + $0x3f4] ss:$24 sps:$4 sm:$0xff]  }
  0x36   :  { %1918 = vmatprep.subr.bf16.mxu1 %v3561_v6  ;;  %v3570_v11 = vld [vmem:[#allocation5 + $0xc4] ss:$24 sps:$4 sm:$0xff]   ;;  %v3569_v12 = vld [vmem:[#allocation5 + $0x3f0] ss:$24 sps:$4 sm:$0xff]   ;;  %v3572_v14 = vld [vmem:[#allocation5 + $0xc0] ss:$24 sps:$4 sm:$0xff]  }
  0x37   :  { %v3573_v13 = vld [vmem:[#allocation5 + $0x3c4] ss:$24 sps:$4 sm:$0xff]   ;;  %v3576_v15 = vld [vmem:[#allocation5 + $0x94] ss:$24 sps:$4 sm:$0xff]   ;;  %v3575_v16 = vld [vmem:[#allocation5 + $0x3c0] ss:$24 sps:$4 sm:$0xff]  }
  0x38   :  { %1876 = vmatpush1.bf16.msra.mxu0 %v3560_v5  ;;  %v3579_v17 = vld [vmem:[#allocation5 + $0x394] ss:$24 sps:$4 sm:$0xff]   ;;  %v3578_v18 = vld [vmem:[#allocation5 + $0x90] ss:$24 sps:$4 sm:$0xff]   ;;  %v3582_v19 = vld [vmem:[#allocation5 + $0x64] ss:$24 sps:$4 sm:$0xff]  }
  0x39   :  { %1877 = vmatprep.subr.bf16.mxu0 %v3564_v8  ;;  %1919 = vmatpush1.bf16.msra.mxu1 %v3563_v7  ;;  %v3581_v20 = vld [vmem:[#allocation5 + $0x390] ss:$24 sps:$4 sm:$0xff]   ;;  %v3585_v21 = vld [vmem:[#allocation5 + $0x364] ss:$24 sps:$4 sm:$0xff]   ;;  %v3584_v22 = vld [vmem:[#allocation5 + $0x60] ss:$24 sps:$4 sm:$0xff]  }
  0x3a   :  { %1920 = vmatprep.subr.bf16.mxu1 %v3567_v10  ;;  %v3588_v23 = vld [vmem:[#allocation5 + $0x34] ss:$24 sps:$4 sm:$0xff]   ;;  %v3587_v24 = vld [vmem:[#allocation5 + $0x360] ss:$24 sps:$4 sm:$0xff]   ;;  %v3590_v26 = vld [vmem:[#allocation5 + $0x30] ss:$24 sps:$4 sm:$0xff]  }
  0x3b   :  { %v3591_v25 = vld [vmem:[#allocation5 + $0x334] ss:$24 sps:$4 sm:$0xff]   ;;  %v3594_v27 = vld [vmem:[#allocation5 + $0x4] ss:$24 sps:$4 sm:$0xff]   ;;  %v3593_v28 = vld [vmem:[#allocation5 + $0x330] ss:$24 sps:$4 sm:$0xff]  }
  0x3c   :  { %1878 = vmatpush1.bf16.msra.mxu0 %v3566_v9  ;;  %v3597_v29 = vld [vmem:[#allocation5 + $0x304] ss:$24 sps:$4 sm:$0xff]   ;;  %v3596_v30 = vld [vmem:[#allocation5] ss:$24 sps:$4 sm:$0xff]   ;;  %v3600_v31 = vld [vmem:[#allocation5 + $0x2d4] ss:$24 sps:$4 sm:$0xff]  }
  0x3d   :  { %1879 = vmatprep.subr.bf16.mxu0 %v3570_v11  ;;  %1921 = vmatpush1.bf16.msra.mxu1 %v3569_v12  ;;  %v3599_v32 = vld [vmem:[#allocation5 + $0x300] ss:$24 sps:$4 sm:$0xff]   ;;  %v3603_v33 = vld [vmem:[#allocation5 + $0x5d4] ss:$24 sps:$4 sm:$0xff]   ;;  %v3602_v34 = vld [vmem:[#allocation5 + $0x2d0] ss:$24 sps:$4 sm:$0xff]  }
  0x3e   :  { %1922 = vmatprep.subr.bf16.mxu1 %v3573_v13  ;;  %v3606_v35 = vld [vmem:[#allocation5 + $0x2a4] ss:$24 sps:$4 sm:$0xff]   ;;  %v3605_v36 = vld [vmem:[#allocation5 + $0x5d0] ss:$24 sps:$4 sm:$0xff]   ;;  %v3608_v38 = vld [vmem:[#allocation5 + $0x2a0] ss:$24 sps:$4 sm:$0xff]  }
  0x3f   :  { %v3609_v37 = vld [vmem:[#allocation5 + $0x5a4] ss:$24 sps:$4 sm:$0xff]   ;;  %v3612_v39 = vld [vmem:[#allocation5 + $0x274] ss:$24 sps:$4 sm:$0xff]   ;;  %v3611_v40 = vld [vmem:[#allocation5 + $0x5a0] ss:$24 sps:$4 sm:$0xff]  }
  0x40   :  { %1880 = vmatpush1.bf16.msra.mxu0 %v3572_v14  ;;  %v3615_v41 = vld [vmem:[#allocation5 + $0x574] ss:$24 sps:$4 sm:$0xff]   ;;  %v3614_v42 = vld [vmem:[#allocation5 + $0x270] ss:$24 sps:$4 sm:$0xff]   ;;  %v3618_v43 = vld [vmem:[#allocation5 + $0x244] ss:$24 sps:$4 sm:$0xff]  }
  0x41   :  { %1881 = vmatprep.subr.bf16.mxu0 %v3576_v15  ;;  %1923 = vmatpush1.bf16.msra.mxu1 %v3575_v16  ;;  %v3617_v44 = vld [vmem:[#allocation5 + $0x570] ss:$24 sps:$4 sm:$0xff]   ;;  %v3621_v45 = vld [vmem:[#allocation5 + $0x544] ss:$24 sps:$4 sm:$0xff]   ;;  %v3620_v46 = vld [vmem:[#allocation5 + $0x240] ss:$24 sps:$4 sm:$0xff]  }
  0x42   :  { %1924 = vmatprep.subr.bf16.mxu1 %v3579_v17  ;;  %v3647_v47 = vld [vmem:[#allocation2 + $0x4] ss:$24 sps:$4 sm:$0xff]   ;;  %v3623_v49 = vld [vmem:[#allocation5 + $0x540] ss:$24 sps:$4 sm:$0xff]   ;;  %v3626_v52 = vld [vmem:[#allocation5 + $0x210] ss:$24 sps:$4 sm:$0xff]  }
  0x43   :  { %v3624_v48 = vld [vmem:[#allocation5 + $0x214] ss:$24 sps:$4 sm:$0xff]   ;;  %1905 = vmatprep.mubr.bf16.mxu0 %v3647_v47  ;;  %v3630_v53 = vld [vmem:[#allocation5 + $0x1e4] ss:$24 sps:$4 sm:$0xff]   ;;  %v3629_v54 = vld [vmem:[#allocation5 + $0x510] ss:$24 sps:$4 sm:$0xff]  }
  0x44   :  { %1882 = vmatpush1.bf16.msra.mxu0 %v3578_v18  ;;  %v3627_v50 = vld [vmem:[#allocation5 + $0x514] ss:$24 sps:$4 sm:$0xff]   ;;  %v3633_v55 = vld [vmem:[#allocation5 + $0x4e4] ss:$24 sps:$4 sm:$0xff]   ;;  %v3632_v56 = vld [vmem:[#allocation5 + $0x1e0] ss:$24 sps:$4 sm:$0xff]  }
  0x45   :  { %1883 = vmatprep.subr.bf16.mxu0 %v3582_v19  ;;  %1925 = vmatpush1.bf16.msra.mxu1 %v3581_v20  ;;  %v4255_v51 = vld [vmem:[#allocation2 + $0xc] ss:$24 sps:$4 sm:$0xff]   ;;  %v3635_v58 = vld [vmem:[#allocation5 + $0x4e0] ss:$24 sps:$4 sm:$0xff]   ;;  %v3638_v60 = vld [vmem:[#allocation5 + $0x1b0] ss:$24 sps:$4 sm:$0xff]  }
  0x46   :  { %1926 = vmatprep.subr.bf16.mxu1 %v3585_v21  ;;  %1948 = vmatprep.mubr.bf16.mxu1 %v4255_v51  ;;  %v3636_v57 = vld [vmem:[#allocation5 + $0x1b4] ss:$24 sps:$4 sm:$0xff]   ;;  %v3642_v61 = vld [vmem:[#allocation5 + $0x184] ss:$24 sps:$4 sm:$0xff]   ;;  %v3641_v62 = vld [vmem:[#allocation5 + $0x4b0] ss:$24 sps:$4 sm:$0xff]  }
  0x47   :  { %v3639_v59 = vld [vmem:[#allocation5 + $0x4b4] ss:$24 sps:$4 sm:$0xff]   ;;  %v3645_v63 = vld [vmem:[#allocation5 + $0x484] ss:$24 sps:$4 sm:$0xff]   ;;  %v3644_v0 = vld [vmem:[#allocation5 + $0x180] ss:$24 sps:$4 sm:$0xff]  }
  0x48   :  { %1884 = vmatpush1.bf16.msra.mxu0 %v3584_v22  ;;  %v3653_v1 = vld [vmem:[#allocation5 + $0x754] ss:$24 sps:$4 sm:$0xff]   ;;  %v3649_v2 = vld [vmem:[#allocation5 + $0x480] ss:$24 sps:$4 sm:$0xff]   ;;  %v4258_v3 = vld [vmem:[#allocation2] ss:$24 sps:$4 sm:$0xff]  }
  0x49   :  { %1885 = vmatprep.subr.bf16.mxu0 %v3588_v23  ;;  %1927 = vmatpush1.bf16.msra.mxu1 %v3587_v24  ;;  %v3659_v4 = vld [vmem:[#allocation5 + $0x15c] ss:$24 sps:$4 sm:$0xff]   ;;  %v3651_v5 = vld [vmem:[#allocation5 + $0x750] ss:$24 sps:$4 sm:$0xff]   ;;  %v3665_v9 = vld [vmem:[#allocation5 + $0x12c] ss:$24 sps:$4 sm:$0xff]  }
  0x4a   :  { %1928 = vmatprep.subr.bf16.mxu1 %v3591_v25  ;;  %v4260_v6 = vld [vmem:[#allocation2 + $0x8] ss:$24 sps:$4 sm:$0xff]   ;;  %v3662_v7 = vld [vmem:[#allocation5 + $0x724] ss:$24 sps:$4 sm:$0xff]   ;;  %v3668_v11 = vld [vmem:[#allocation5 + $0x6f4] ss:$24 sps:$4 sm:$0xff]  }
  0x4b   :  { %v3657_v8 = vld [vmem:[#allocation5 + $0x158] ss:$24 sps:$4 sm:$0xff]   ;;  %v3663_v12 = vld [vmem:[#allocation5 + $0x128] ss:$24 sps:$4 sm:$0xff]   ;;  %v3671_v13 = vld [vmem:[#allocation5 + $0xfc] ss:$24 sps:$4 sm:$0xff]  }
  0x4c   :  { %1886 = vmatpush1.bf16.msra.mxu0 %v3590_v26  ;;  %v3660_v10 = vld [vmem:[#allocation5 + $0x720] ss:$24 sps:$4 sm:$0xff]   ;;  %v3666_v14 = vld [vmem:[#allocation5 + $0x6f0] ss:$24 sps:$4 sm:$0xff]   ;;  %v3674_v15 = vld [vmem:[#allocation5 + $0x6c4] ss:$24 sps:$4 sm:$0xff]  }
  0x4d   :  { %1887 = vmatprep.subr.bf16.mxu0 %v3594_v27  ;;  %1929 = vmatpush1.bf16.msra.mxu1 %v3593_v28  ;;  %v3669_v16 = vld [vmem:[#allocation5 + $0xf8] ss:$24 sps:$4 sm:$0xff]   ;;  %v3677_v17 = vld [vmem:[#allocation5 + $0xcc] ss:$24 sps:$4 sm:$0xff]   ;;  %v3675_v20 = vld [vmem:[#allocation5 + $0xc8] ss:$24 sps:$4 sm:$0xff]  }
  0x4e   :  { %1930 = vmatprep.subr.bf16.mxu1 %v3597_v29  ;;  %v3672_v18 = vld [vmem:[#allocation5 + $0x6c0] ss:$24 sps:$4 sm:$0xff]   ;;  %v3680_v19 = vld [vmem:[#allocation5 + $0x694] ss:$24 sps:$4 sm:$0xff]   ;;  %v3678_v22 = vld [vmem:[#allocation5 + $0x690] ss:$24 sps:$4 sm:$0xff]  }
  0x4f   :  { %v3683_v21 = vld [vmem:[#allocation5 + $0x9c] ss:$24 sps:$4 sm:$0xff]   ;;  %v3681_v24 = vld [vmem:[#allocation5 + $0x98] ss:$24 sps:$4 sm:$0xff]   ;;  %v3689_v25 = vld [vmem:[#allocation5 + $0x6c] ss:$24 sps:$4 sm:$0xff]  }
  0x50   :  { %1888 = vmatpush1.bf16.msra.mxu0 %v3596_v30  ;;  %v3686_v23 = vld [vmem:[#allocation5 + $0x664] ss:$24 sps:$4 sm:$0xff]   ;;  %v3684_v26 = vld [vmem:[#allocation5 + $0x660] ss:$24 sps:$4 sm:$0xff]   ;;  %v3692_v27 = vld [vmem:[#allocation5 + $0x634] ss:$24 sps:$4 sm:$0xff]  }
  0x51   :  { %1889 = vmatprep.subr.bf16.mxu0 %v3600_v31  ;;  %1931 = vmatpush1.bf16.msra.mxu1 %v3599_v32  ;;  %v3687_v28 = vld [vmem:[#allocation5 + $0x68] ss:$24 sps:$4 sm:$0xff]   ;;  %v3695_v29 = vld [vmem:[#allocation5 + $0x3c] ss:$24 sps:$4 sm:$0xff]   ;;  %v3693_v31 = vld [vmem:[#allocation5 + $0x38] ss:$24 sps:$4 sm:$0xff]  }
  0x52   :  { %1932 = vmatprep.subr.bf16.mxu1 %v3603_v33  ;;  %v3690_v30 = vld [vmem:[#allocation5 + $0x630] ss:$24 sps:$4 sm:$0xff]   ;;  %v3698_v32 = vld [vmem:[#allocation5 + $0x604] ss:$24 sps:$4 sm:$0xff]   ;;  %s4215_s2 = smov [#allocation10]  }
  0x53   :  { %v4264_v33 = vld [vmem:[#allocation2 + $0x14] ss:$24 sps:$4 sm:$0xff]   ;;  %s3106_s3 = sshll.u32 %s4215_s2, 4  ;;  %s3107_s3 = int_to_ptr.vmem [resolvable:$true] %s3106_s3 }
  0x54   :  { %1890 = vmatpush2.bf16.msra.mxu0 %v3602_v34  ;;  %v3701_v34 = vld [vmem:[#allocation5 + $0xc] ss:$24 sps:$4 sm:$0xff]   ;;  %s4179_s11 = scalar_lea.vmem %s3107_s3, 256  ;;  %p4184_p7 = scmp.lt.s32.totalorder %s3107_s3, %s3107_s3 }
  0x55   :  { %1891 = vmatprep.subr.bf16.mxu0 %v3606_v35  ;;  %1933 = vmatpush2.bf16.msra.mxu1 %v3605_v36  ;;  %v3696_v35 = vld [vmem:[#allocation5 + $0x600] ss:$24 sps:$4 sm:$0xff]   ;;  %v3704_v36 = vld [vmem:[#allocation5 + $0x8d4] ss:$24 sps:$4 sm:$0xff]   ;;  %p4180_p6 = scmp.ne.s32.totalorder %s3107_s3, %s4179_s11  ;;  %p4185_p8 = scmp.lt.s32.totalorder %s4179_s11, %s4179_s11 }
  0x56   :  { %1934 = vmatprep.subr.bf16.mxu1 %v3609_v37  ;;  %v3699_v37 = vld [vmem:[#allocation5 + $0x8] ss:$24 sps:$4 sm:$0xff]  }
  0x57   :  { %p4186_p9 = por %p4185_p8, %p4184_p7 }
  0x58   :  { %1892 = vmatpush2.bf16.msra.mxu0 %v3608_v38  ;;  %v3707_v38 = vld [vmem:[#allocation5 + $0x2dc] ss:$24 sps:$4 sm:$0xff]  }
  0x59   :  { %1893 = vmatprep.subr.bf16.mxu0 %v3612_v39  ;;  %1935 = vmatpush2.bf16.msra.mxu1 %v3611_v40  ;;  %v3702_v39 = vld [vmem:[#allocation5 + $0x8d0] ss:$24 sps:$4 sm:$0xff]   ;;  %v3710_v40 = vld [vmem:[#allocation5 + $0x8a4] ss:$24 sps:$4 sm:$0xff]   ;;  %p4187_p10 = pnand %p4186_p9, %p4180_p6 }
  0x5a   :  { %1936 = vmatprep.subr.bf16.mxu1 %v3615_v41  ;;  %v3705_v41 = vld [vmem:[#allocation5 + $0x2d8] ss:$24 sps:$4 sm:$0xff]  }
  0x5c   :  { %1894 = vmatpush2.bf16.msra.mxu0 %v3614_v42  ;;  %v3713_v42 = vld [vmem:[#allocation5 + $0x2ac] ss:$24 sps:$4 sm:$0xff]  }
  0x5d   :  { %1895 = vmatprep.subr.bf16.mxu0 %v3618_v43  ;;  %1937 = vmatpush2.bf16.msra.mxu1 %v3617_v44  ;;  %v3708_v43 = vld [vmem:[#allocation5 + $0x8a0] ss:$24 sps:$4 sm:$0xff]   ;;  %v3716_v44 = vld [vmem:[#allocation5 + $0x874] ss:$24 sps:$4 sm:$0xff]  }
  0x5e   :  { %1938 = vmatprep.subr.bf16.mxu1 %v3621_v45  ;;  %v3711_v45 = vld [vmem:[#allocation5 + $0x2a8] ss:$24 sps:$4 sm:$0xff]  }
  0x60   :  { %1896 = vmatpush2.bf16.msra.mxu0 %v3620_v46  ;;  %v3719_v46 = vld [vmem:[#allocation5 + $0x27c] ss:$24 sps:$4 sm:$0xff]  }
  0x61   :  { %1897 = vmatprep.subr.bf16.mxu0 %v3624_v48  ;;  %1939 = vmatpush2.bf16.msra.mxu1 %v3623_v49  ;;  %v3722_v48 = vld [vmem:[#allocation5 + $0x844] ss:$24 sps:$4 sm:$0xff]   ;;  %v3717_v49 = vld [vmem:[#allocation5 + $0x278] ss:$24 sps:$4 sm:$0xff]  }
  0x62   :  { %1940 = vmatprep.subr.bf16.mxu1 %v3627_v50  ;;  %v3725_v50 = vld [vmem:[#allocation5 + $0x24c] ss:$24 sps:$4 sm:$0xff]  }
  0x64   :  { %1898 = vmatpush2.bf16.msra.mxu0 %v3626_v52  ;;  %v3720_v52 = vld [vmem:[#allocation5 + $0x840] ss:$24 sps:$4 sm:$0xff]  }
  0x65   :  { %1899 = vmatprep.subr.bf16.mxu0 %v3630_v53  ;;  %1941 = vmatpush2.bf16.msra.mxu1 %v3629_v54  ;;  %v3728_v53 = vld [vmem:[#allocation5 + $0x814] ss:$24 sps:$4 sm:$0xff]   ;;  %v3723_v54 = vld [vmem:[#allocation5 + $0x248] ss:$24 sps:$4 sm:$0xff]  }
  0x66   :  { %1942 = vmatprep.subr.bf16.mxu1 %v3633_v55  ;;  %v3731_v55 = vld [vmem:[#allocation5 + $0x21c] ss:$24 sps:$4 sm:$0xff]  }
  0x68   :  { %1900 = vmatpush2.bf16.msra.mxu0 %v3632_v56  ;;  %v3726_v56 = vld [vmem:[#allocation5 + $0x810] ss:$24 sps:$4 sm:$0xff]  }
  0x69   :  { %1901 = vmatprep.subr.bf16.mxu0 %v3636_v57  ;;  %1943 = vmatpush2.bf16.msra.mxu1 %v3635_v58  ;;  %v3734_v57 = vld [vmem:[#allocation5 + $0x7e4] ss:$24 sps:$4 sm:$0xff]   ;;  %v3729_v58 = vld [vmem:[#allocation5 + $0x218] ss:$24 sps:$4 sm:$0xff]  }
  0x6a   :  { %1944 = vmatprep.subr.bf16.mxu1 %v3639_v59  ;;  %v3737_v59 = vld [vmem:[#allocation5 + $0x1ec] ss:$24 sps:$4 sm:$0xff]  }
  0x6c   :  { %1902 = vmatpush2.bf16.msra.mxu0 %v3638_v60  ;;  %v3732_v60 = vld [vmem:[#allocation5 + $0x7e0] ss:$24 sps:$4 sm:$0xff]  }
  0x6d   :  { %1903 = vmatprep.subr.bf16.mxu0 %v3642_v61  ;;  %1945 = vmatpush2.bf16.msra.mxu1 %v3641_v62  ;;  %v3740_v61 = vld [vmem:[#allocation5 + $0x7b4] ss:$24 sps:$4 sm:$0xff]   ;;  %v3735_v62 = vld [vmem:[#allocation5 + $0x1e8] ss:$24 sps:$4 sm:$0xff]  }
  0x6e   :  { %1946 = vmatprep.subr.bf16.mxu1 %v3645_v63  ;;  %v3743_v63 = vld [vmem:[#allocation5 + $0x1bc] ss:$24 sps:$4 sm:$0xff]  }
  0x70   :  { %1904 = vmatpush2.bf16.msra.mxu0 %v3644_v0  ;;  %v3738_v0 = vld [vmem:[#allocation5 + $0x7b0] ss:$24 sps:$4 sm:$0xff]  }
  0x71   :  { %1959 = vmatprep.subr.bf16.mxu0 %v3653_v1  ;;  %1947 = vmatpush2.bf16.msra.mxu1 %v3649_v2  ;;  %v3746_v1 = vld [vmem:[#allocation5 + $0x784] ss:$24 sps:$4 sm:$0xff]   ;;  %v3741_v2 = vld [vmem:[#allocation5 + $0x1b8] ss:$24 sps:$4 sm:$0xff]  }
  0x72   :  { %2002 = vmatprep.subr.bf16.mxu1 %v3659_v4  ;;  %v3749_v4 = vld [vmem:[#allocation5 + $0x18c] ss:$24 sps:$4 sm:$0xff]  }
  0x73   :  { %1906 = vmatmul.mubr.bf16.vlgmr.msra.gmra.mxu0 %v4258_v3 }
  0x74   :  { %1960 = vmatpush1.bf16.msra.mxu0 %v3651_v5  ;;  %1949 = vmatmul.mubr.bf16.vlgmr.msra.gmra.mxu1 %v4260_v6  ;;  %v3744_v5 = vld [vmem:[#allocation5 + $0x780] ss:$24 sps:$4 sm:$0xff]  }
  0x75   :  { %1961 = vmatprep.subr.bf16.mxu0 %v3662_v7  ;;  %2003 = vmatpush1.bf16.msra.mxu1 %v3657_v8  ;;  %v3755_v7 = vld [vmem:[#allocation5 + $0x45c] ss:$24 sps:$4 sm:$0xff]   ;;  %v3747_v8 = vld [vmem:[#allocation5 + $0x188] ss:$24 sps:$4 sm:$0xff]  }
  0x76   :  { %2034 = vmatprep.mubr.bf16.mxu1 %v3647_v47  ;;  %2004 = vmatprep.subr.bf16.mxu1 %v3665_v9  ;;  %v3714_v47 = vld [vmem:[#allocation5 + $0x870] ss:$24 sps:$4 sm:$0xff]   ;;  %v4267_v9 = vld [vmem:[#allocation2 + $0x10] ss:$24 sps:$4 sm:$0xff]  }
  0x77   :  { %1991 = vmatprep.mubr.bf16.mxu0 %v4264_v33 }
  0x78   :  { %1962 = vmatpush1.bf16.msra.mxu0 %v3660_v10  ;;  %v3758_v10 = vld [vmem:[#allocation5 + $0x75c] ss:$24 sps:$4 sm:$0xff]  }
  0x79   :  { %1963 = vmatprep.subr.bf16.mxu0 %v3668_v11  ;;  %2005 = vmatpush1.bf16.msra.mxu1 %v3663_v12  ;;  %v3753_v11 = vld [vmem:[#allocation5 + $0x458] ss:$24 sps:$4 sm:$0xff]   ;;  %v3761_v12 = vld [vmem:[#allocation5 + $0x42c] ss:$24 sps:$4 sm:$0xff]  }
  0x7a   :  { %2006 = vmatprep.subr.bf16.mxu1 %v3671_v13  ;;  %v3756_v13 = vld [vmem:[#allocation5 + $0x758] ss:$24 sps:$4 sm:$0xff]  }
  0x7c   :  { %1964 = vmatpush1.bf16.msra.mxu0 %v3666_v14  ;;  %v3764_v14 = vld [vmem:[#allocation5 + $0x72c] ss:$24 sps:$4 sm:$0xff]  }
  0x7d   :  { %1965 = vmatprep.subr.bf16.mxu0 %v3674_v15  ;;  %2007 = vmatpush1.bf16.msra.mxu1 %v3669_v16  ;;  %v3759_v15 = vld [vmem:[#allocation5 + $0x428] ss:$24 sps:$4 sm:$0xff]   ;;  %v3767_v16 = vld [vmem:[#allocation5 + $0x3fc] ss:$24 sps:$4 sm:$0xff]  }
  0x7e   :  { %2008 = vmatprep.subr.bf16.mxu1 %v3677_v17  ;;  %v3762_v17 = vld [vmem:[#allocation5 + $0x728] ss:$24 sps:$4 sm:$0xff]  }
  0x80   :  { %1966 = vmatpush1.bf16.msra.mxu0 %v3672_v18  ;;  %v3770_v18 = vld [vmem:[#allocation5 + $0x6fc] ss:$24 sps:$4 sm:$0xff]  }
  0x81   :  { %1967 = vmatprep.subr.bf16.mxu0 %v3680_v19  ;;  %2009 = vmatpush1.bf16.msra.mxu1 %v3675_v20  ;;  %v3765_v19 = vld [vmem:[#allocation5 + $0x3f8] ss:$24 sps:$4 sm:$0xff]   ;;  %v3773_v20 = vld [vmem:[#allocation5 + $0x3cc] ss:$24 sps:$4 sm:$0xff]  }
  0x82   :  { %2010 = vmatprep.subr.bf16.mxu1 %v3683_v21  ;;  %v3768_v21 = vld [vmem:[#allocation5 + $0x6f8] ss:$24 sps:$4 sm:$0xff]  }
  0x84   :  { %1968 = vmatpush1.bf16.msra.mxu0 %v3678_v22  ;;  %v3776_v22 = vld [vmem:[#allocation5 + $0x6cc] ss:$24 sps:$4 sm:$0xff]  }
  0x85   :  { %1969 = vmatprep.subr.bf16.mxu0 %v3686_v23  ;;  %2011 = vmatpush1.bf16.msra.mxu1 %v3681_v24  ;;  %v3774_v23 = vld [vmem:[#allocation5 + $0x6c8] ss:$24 sps:$4 sm:$0xff]   ;;  %v3782_v24 = vld [vmem:[#allocation5 + $0x69c] ss:$24 sps:$4 sm:$0xff]  }
  0x86   :  { %2012 = vmatprep.subr.bf16.mxu1 %v3689_v25  ;;  %v3777_v25 = vld [vmem:[#allocation5 + $0x398] ss:$24 sps:$4 sm:$0xff]  }
  0x88   :  { %1970 = vmatpush1.bf16.msra.mxu0 %v3684_v26  ;;  %v3785_v26 = vld [vmem:[#allocation5 + $0x36c] ss:$24 sps:$4 sm:$0xff]  }
  0x89   :  { %1971 = vmatprep.subr.bf16.mxu0 %v3692_v27  ;;  %2013 = vmatpush1.bf16.msra.mxu1 %v3687_v28  ;;  %v3780_v27 = vld [vmem:[#allocation5 + $0x698] ss:$24 sps:$4 sm:$0xff]   ;;  %v3788_v28 = vld [vmem:[#allocation5 + $0x66c] ss:$24 sps:$4 sm:$0xff]  }
  0x8a   :  { %2014 = vmatprep.subr.bf16.mxu1 %v3695_v29  ;;  %v3783_v29 = vld [vmem:[#allocation5 + $0x368] ss:$24 sps:$4 sm:$0xff]  }
  0x8c   :  { %1972 = vmatpush1.bf16.msra.mxu0 %v3690_v30  ;;  %v3791_v30 = vld [vmem:[#allocation5 + $0x33c] ss:$24 sps:$4 sm:$0xff]  }
  0x8d   :  { %1973 = vmatprep.subr.bf16.mxu0 %v3698_v32  ;;  %2015 = vmatpush1.bf16.msra.mxu1 %v3693_v31  ;;  %v3786_v31 = vld [vmem:[#allocation5 + $0x668] ss:$24 sps:$4 sm:$0xff]   ;;  %v3794_v32 = vld [vmem:[#allocation5 + $0x63c] ss:$24 sps:$4 sm:$0xff]  }
  0x8e   :  { %2016 = vmatprep.subr.bf16.mxu1 %v3701_v34  ;;  %v3797_v34 = vld [vmem:[#allocation5 + $0x30c] ss:$24 sps:$4 sm:$0xff]  }
  0x90   :  { %1974 = vmatpush1.bf16.msra.mxu0 %v3696_v35  ;;  %v3792_v35 = vld [vmem:[#allocation5 + $0x638] ss:$24 sps:$4 sm:$0xff]  }
  0x91   :  { %1975 = vmatprep.subr.bf16.mxu0 %v3704_v36  ;;  %2017 = vmatpush1.bf16.msra.mxu1 %v3699_v37  ;;  %v3800_v36 = vld [vmem:[#allocation5 + $0x60c] ss:$24 sps:$4 sm:$0xff]   ;;  %v3795_v37 = vld [vmem:[#allocation5 + $0x308] ss:$24 sps:$4 sm:$0xff]  }
  0x92   :  { %2018 = vmatprep.subr.bf16.mxu1 %v3707_v38  ;;  %v3803_v38 = vld [vmem:[#allocation5 + $0x5dc] ss:$24 sps:$4 sm:$0xff]  }
  0x94   :  { %1976 = vmatpush2.bf16.msra.mxu0 %v3702_v39  ;;  %v3798_v39 = vld [vmem:[#allocation5 + $0x608] ss:$24 sps:$4 sm:$0xff]  }
  0x95   :  { %1977 = vmatprep.subr.bf16.mxu0 %v3710_v40  ;;  %2019 = vmatpush2.bf16.msra.mxu1 %v3705_v41  ;;  %v3806_v40 = vld [vmem:[#allocation5 + $0x8dc] ss:$24 sps:$4 sm:$0xff]   ;;  %v3801_v41 = vld [vmem:[#allocation5 + $0x5d8] ss:$24 sps:$4 sm:$0xff]  }
  0x96   :  { %2020 = vmatprep.subr.bf16.mxu1 %v3713_v42  ;;  %v3809_v42 = vld [vmem:[#allocation5 + $0x5ac] ss:$24 sps:$4 sm:$0xff]  }
  0x98   :  { %1978 = vmatpush2.bf16.msra.mxu0 %v3708_v43  ;;  %v3804_v43 = vld [vmem:[#allocation5 + $0x8d8] ss:$24 sps:$4 sm:$0xff]  }
  0x99   :  { %1979 = vmatprep.subr.bf16.mxu0 %v3716_v44  ;;  %2021 = vmatpush2.bf16.msra.mxu1 %v3711_v45  ;;  %v3812_v44 = vld [vmem:[#allocation5 + $0x8ac] ss:$24 sps:$4 sm:$0xff]   ;;  %v3807_v45 = vld [vmem:[#allocation5 + $0x5a8] ss:$24 sps:$4 sm:$0xff]  }
  0x9a   :  { %2022 = vmatprep.subr.bf16.mxu1 %v3719_v46  ;;  %v3815_v46 = vld [vmem:[#allocation5 + $0x57c] ss:$24 sps:$4 sm:$0xff]  }
  0x9c   :  { %1980 = vmatpush2.bf16.msra.mxu0 %v3714_v47  ;;  %v3810_v47 = vld [vmem:[#allocation5 + $0x8a8] ss:$24 sps:$4 sm:$0xff]  }
  0x9d   :  { %1981 = vmatprep.subr.bf16.mxu0 %v3722_v48  ;;  %2023 = vmatpush2.bf16.msra.mxu1 %v3717_v49  ;;  %v3818_v48 = vld [vmem:[#allocation5 + $0x87c] ss:$24 sps:$4 sm:$0xff]   ;;  %v3813_v49 = vld [vmem:[#allocation5 + $0x578] ss:$24 sps:$4 sm:$0xff]  }
  0x9e   :  { %2024 = vmatprep.subr.bf16.mxu1 %v3725_v50  ;;  %v3821_v50 = vld [vmem:[#allocation5 + $0x54c] ss:$24 sps:$4 sm:$0xff]  }
  0xa0   :  { %1982 = vmatpush2.bf16.msra.mxu0 %v3720_v52  ;;  %v3816_v52 = vld [vmem:[#allocation5 + $0x878] ss:$24 sps:$4 sm:$0xff]  }
  0xa1   :  { %1983 = vmatprep.subr.bf16.mxu0 %v3728_v53  ;;  %2025 = vmatpush2.bf16.msra.mxu1 %v3723_v54  ;;  %v3824_v53 = vld [vmem:[#allocation5 + $0x84c] ss:$24 sps:$4 sm:$0xff]   ;;  %v3819_v54 = vld [vmem:[#allocation5 + $0x548] ss:$24 sps:$4 sm:$0xff]  }
  0xa2   :  { %2026 = vmatprep.subr.bf16.mxu1 %v3731_v55  ;;  %v3827_v55 = vld [vmem:[#allocation5 + $0x51c] ss:$24 sps:$4 sm:$0xff]  }
  0xa4   :  { %1984 = vmatpush2.bf16.msra.mxu0 %v3726_v56  ;;  %v3822_v56 = vld [vmem:[#allocation5 + $0x848] ss:$24 sps:$4 sm:$0xff]  }
  0xa5   :  { %1985 = vmatprep.subr.bf16.mxu0 %v3734_v57  ;;  %2027 = vmatpush2.bf16.msra.mxu1 %v3729_v58  ;;  %v3830_v57 = vld [vmem:[#allocation5 + $0x81c] ss:$24 sps:$4 sm:$0xff]   ;;  %v3825_v58 = vld [vmem:[#allocation5 + $0x518] ss:$24 sps:$4 sm:$0xff]  }
  0xa6   :  { %2028 = vmatprep.subr.bf16.mxu1 %v3737_v59  ;;  %v3833_v59 = vld [vmem:[#allocation5 + $0x4ec] ss:$24 sps:$4 sm:$0xff]  }
  0xa8   :  { %1986 = vmatpush2.bf16.msra.mxu0 %v3732_v60  ;;  %v3828_v60 = vld [vmem:[#allocation5 + $0x818] ss:$24 sps:$4 sm:$0xff]  }
  0xa9   :  { %1987 = vmatprep.subr.bf16.mxu0 %v3740_v61  ;;  %2029 = vmatpush2.bf16.msra.mxu1 %v3735_v62  ;;  %v3836_v61 = vld [vmem:[#allocation5 + $0x7ec] ss:$24 sps:$4 sm:$0xff]   ;;  %v3831_v62 = vld [vmem:[#allocation5 + $0x4e8] ss:$24 sps:$4 sm:$0xff]  }
  0xaa   :  { %2030 = vmatprep.subr.bf16.mxu1 %v3743_v63  ;;  %v3839_v63 = vld [vmem:[#allocation5 + $0x4bc] ss:$24 sps:$4 sm:$0xff]  }
  0xac   :  { %1988 = vmatpush2.bf16.msra.mxu0 %v3738_v0  ;;  %v3834_v0 = vld [vmem:[#allocation5 + $0x7e8] ss:$24 sps:$4 sm:$0xff]  }
  0xad   :  { %1989 = vmatprep.subr.bf16.mxu0 %v3746_v1  ;;  %2031 = vmatpush2.bf16.msra.mxu1 %v3741_v2  ;;  %v3842_v1 = vld [vmem:[#allocation5 + $0x7bc] ss:$24 sps:$4 sm:$0xff]   ;;  %v3837_v2 = vld [vmem:[#allocation5 + $0x4b8] ss:$24 sps:$4 sm:$0xff]  }
  0xae   :  { %2032 = vmatprep.subr.bf16.mxu1 %v3749_v4  ;;  %v3845_v4 = vld [vmem:[#allocation5 + $0x48c] ss:$24 sps:$4 sm:$0xff]  }
  0xb0   :  { %1990 = vmatpush2.bf16.msra.mxu0 %v3744_v5  ;;  %v3840_v5 = vld [vmem:[#allocation5 + $0x7b8] ss:$24 sps:$4 sm:$0xff]  }
  0xb1   :  { %2045 = vmatprep.subr.bf16.mxu0 %v3755_v7  ;;  %2033 = vmatpush2.bf16.msra.mxu1 %v3747_v8  ;;  %v3848_v7 = vld [vmem:[#allocation5 + $0x78c] ss:$24 sps:$4 sm:$0xff]   ;;  %v3843_v8 = vld [vmem:[#allocation5 + $0x488] ss:$24 sps:$4 sm:$0xff]  }
  0xb2   :  { %2088 = vmatprep.subr.bf16.mxu1 %v3758_v10  ;;  %v3851_v10 = vld [vmem:[#allocation5 + $0x164] ss:$24 sps:$4 sm:$0xff]  }
  0xb3   :  { %1992 = vmatmul.mubr.bf16.vlgmr.msra.gmra.mxu0 %v4267_v9 }
  0xb4   :  { %2046 = vmatpush1.bf16.msra.mxu0 %v3753_v11  ;;  %2077 = vmatprep.mubr.bf16.mxu0 %v4255_v51  ;;  %v3771_v51 = vld [vmem:[#allocation5 + $0x3c8] ss:$24 sps:$4 sm:$0xff]  }
  0xb5   :  { %2035 = vmatmul.mubr.bf16.vlgmr.msra.gmra.mxu1 %v4258_v3  ;;  %2047 = vmatprep.subr.bf16.mxu0 %v3761_v12  ;;  %v3779_v3 = vld [vmem:[#allocation5 + $0x39c] ss:$24 sps:$4 sm:$0xff]   ;;  %v3846_v11 = vld [vmem:[#allocation5 + $0x788] ss:$24 sps:$4 sm:$0xff]  }
  0xb6   :  { %2089 = vmatpush1.bf16.msra.mxu1 %v3756_v13  ;;  %2120 = vmatprep.mubr.bf16.mxu1 %v4264_v33  ;;  %v3789_v33 = vld [vmem:[#allocation5 + $0x338] ss:$24 sps:$4 sm:$0xff]   ;;  %v3854_v12 = vld [vmem:[#allocation5 + $0x464] ss:$24 sps:$4 sm:$0xff]  }
  0xb7   :  { %2090 = vmatprep.subr.bf16.mxu1 %v3764_v14  ;;  %v3849_v13 = vld [vmem:[#allocation5 + $0x160] ss:$24 sps:$4 sm:$0xff]   ;;  %v3857_v14 = vld [vmem:[#allocation5 + $0x134] ss:$24 sps:$4 sm:$0xff]  }
  0xb8   :  { %2048 = vmatpush1.bf16.msra.mxu0 %v3759_v15  ;;  %v3852_v15 = vld [vmem:[#allocation5 + $0x460] ss:$24 sps:$4 sm:$0xff]  }
  0xb9   :  { %2049 = vmatprep.subr.bf16.mxu0 %v3767_v16  ;;  %v3855_v16 = vld [vmem:[#allocation5 + $0x130] ss:$24 sps:$4 sm:$0xff]  }
  0xba   :  { %2091 = vmatpush1.bf16.msra.mxu1 %v3762_v17  ;;  %v3860_v17 = vld [vmem:[#allocation5 + $0x434] ss:$24 sps:$4 sm:$0xff]  }
  0xbb   :  { %2092 = vmatprep.subr.bf16.mxu1 %v3770_v18  ;;  %v3858_v18 = vld [vmem:[#allocation5 + $0x430] ss:$24 sps:$4 sm:$0xff]  }
  0xbc   :  { %2050 = vmatpush1.bf16.msra.mxu0 %v3765_v19  ;;  %v3863_v19 = vld [vmem:[#allocation5 + $0x104] ss:$24 sps:$4 sm:$0xff]  }
  0xbd   :  { %2051 = vmatprep.subr.bf16.mxu0 %v3773_v20  ;;  %v4093_v20 = vld [vmem:[#allocation2 + $0x4] ss:$24 sps:$4 sm:$0xff]  }
  0xbe   :  { %2093 = vmatpush1.bf16.msra.mxu1 %v3768_v21  ;;  %v3866_v21 = vld [vmem:[#allocation5 + $0x404] ss:$24 sps:$4 sm:$0xff]  }
  0xbf   :  { %2094 = vmatprep.subr.bf16.mxu1 %v3776_v22  ;;  %v3861_v22 = vld [vmem:[#allocation5 + $0x100] ss:$24 sps:$4 sm:$0xff]  }
  0xc0   :  { %2052 = vmatpush1.bf16.msra.mxu0 %v3771_v51  ;;  %v4094_v51 = vld [vmem:[#allocation2 + $0xc] ss:$24 sps:$4 sm:$0xff]  }
  0xc1   :  { %2053 = vmatprep.subr.bf16.mxu0 %v3779_v3  ;;  %v3869_v3 = vld [vmem:[#allocation5 + $0xd4] ss:$24 sps:$4 sm:$0xff]  }
  0xc2   :  { %2095 = vmatpush1.bf16.msra.mxu1 %v3774_v23  ;;  %v3872_v23 = vld [vmem:[#allocation5 + $0x3d4] ss:$24 sps:$4 sm:$0xff]  }
  0xc3   :  { %2096 = vmatprep.subr.bf16.mxu1 %v3782_v24  ;;  %v3867_v24 = vld [vmem:[#allocation5 + $0xd0] ss:$24 sps:$4 sm:$0xff]  }
  0xc4   :  { %2054 = vmatpush1.bf16.msra.mxu0 %v3777_v25  ;;  %v3875_v25 = vld [vmem:[#allocation5 + $0xa4] ss:$24 sps:$4 sm:$0xff]  }
  0xc5   :  { %2055 = vmatprep.subr.bf16.mxu0 %v3785_v26  ;;  %v3870_v26 = vld [vmem:[#allocation5 + $0x3d0] ss:$24 sps:$4 sm:$0xff]  }
  0xc6   :  { %2097 = vmatpush1.bf16.msra.mxu1 %v3780_v27  ;;  %v3873_v27 = vld [vmem:[#allocation5 + $0xa0] ss:$24 sps:$4 sm:$0xff]  }
  0xc7   :  { %2098 = vmatprep.subr.bf16.mxu1 %v3788_v28  ;;  %v3881_v28 = vld [vmem:[#allocation5 + $0x74] ss:$24 sps:$4 sm:$0xff]  }
  0xc8   :  { %2056 = vmatpush1.bf16.msra.mxu0 %v3783_v29  ;;  %v3876_v29 = vld [vmem:[#allocation5 + $0x3a0] ss:$24 sps:$4 sm:$0xff]  }
  0xc9   :  { %2057 = vmatprep.subr.bf16.mxu0 %v3791_v30  ;;  %v3884_v30 = vld [vmem:[#allocation5 + $0x374] ss:$24 sps:$4 sm:$0xff]  }
  0xca   :  { %2099 = vmatpush1.bf16.msra.mxu1 %v3786_v31  ;;  %v3879_v31 = vld [vmem:[#allocation5 + $0x70] ss:$24 sps:$4 sm:$0xff]  }
  0xcb   :  { %2100 = vmatprep.subr.bf16.mxu1 %v3794_v32  ;;  %v3887_v32 = vld [vmem:[#allocation5 + $0x44] ss:$24 sps:$4 sm:$0xff]  }
  0xcc   :  { %2058 = vmatpush1.bf16.msra.mxu0 %v3789_v33  ;;  %v3882_v33 = vld [vmem:[#allocation5 + $0x370] ss:$24 sps:$4 sm:$0xff]  }
  0xcd   :  { %2059 = vmatprep.subr.bf16.mxu0 %v3797_v34  ;;  %v3890_v34 = vld [vmem:[#allocation5 + $0x344] ss:$24 sps:$4 sm:$0xff]  }
  0xce   :  { %2101 = vmatpush1.bf16.msra.mxu1 %v3792_v35  ;;  %v3885_v35 = vld [vmem:[#allocation5 + $0x40] ss:$24 sps:$4 sm:$0xff]  }
  0xcf   :  { %2102 = vmatprep.subr.bf16.mxu1 %v3800_v36  ;;  %v3893_v36 = vld [vmem:[#allocation5 + $0x14] ss:$24 sps:$4 sm:$0xff]  }
  0xd0   :  { %2060 = vmatpush1.bf16.msra.mxu0 %v3795_v37  ;;  %v3888_v37 = vld [vmem:[#allocation5 + $0x340] ss:$24 sps:$4 sm:$0xff]  }
  0xd1   :  { %2061 = vmatprep.subr.bf16.mxu0 %v3803_v38  ;;  %v3896_v38 = vld [vmem:[#allocation5 + $0x314] ss:$24 sps:$4 sm:$0xff]  }
  0xd2   :  { %2103 = vmatpush1.bf16.msra.mxu1 %v3798_v39  ;;  %v3891_v39 = vld [vmem:[#allocation5 + $0x10] ss:$24 sps:$4 sm:$0xff]  }
  0xd3   :  { %2104 = vmatprep.subr.bf16.mxu1 %v3806_v40  ;;  %v3899_v40 = vld [vmem:[#allocation5 + $0x2e4] ss:$24 sps:$4 sm:$0xff]  }
  0xd4   :  { %2062 = vmatpush2.bf16.msra.mxu0 %v3801_v41  ;;  %v3894_v41 = vld [vmem:[#allocation5 + $0x310] ss:$24 sps:$4 sm:$0xff]  }
  0xd5   :  { %2063 = vmatprep.subr.bf16.mxu0 %v3809_v42  ;;  %v3902_v42 = vld [vmem:[#allocation5 + $0x5e4] ss:$24 sps:$4 sm:$0xff]  }
  0xd6   :  { %2105 = vmatpush2.bf16.msra.mxu1 %v3804_v43  ;;  %v3897_v43 = vld [vmem:[#allocation5 + $0x2e0] ss:$24 sps:$4 sm:$0xff]  }
  0xd7   :  { %2106 = vmatprep.subr.bf16.mxu1 %v3812_v44  ;;  %v3905_v44 = vld [vmem:[#allocation5 + $0x2b4] ss:$24 sps:$4 sm:$0xff]  }
  0xd8   :  { %2064 = vmatpush2.bf16.msra.mxu0 %v3807_v45  ;;  %v3900_v45 = vld [vmem:[#allocation5 + $0x5e0] ss:$24 sps:$4 sm:$0xff]  }
  0xd9   :  { %2065 = vmatprep.subr.bf16.mxu0 %v3815_v46  ;;  %v3908_v46 = vld [vmem:[#allocation5 + $0x5b4] ss:$24 sps:$4 sm:$0xff]  }
  0xda   :  { %2107 = vmatpush2.bf16.msra.mxu1 %v3810_v47  ;;  %v3903_v47 = vld [vmem:[#allocation5 + $0x2b0] ss:$24 sps:$4 sm:$0xff]  }
  0xdb   :  { %2108 = vmatprep.subr.bf16.mxu1 %v3818_v48  ;;  %v3911_v48 = vld [vmem:[#allocation5 + $0x284] ss:$24 sps:$4 sm:$0xff]  }
  0xdc   :  { %2066 = vmatpush2.bf16.msra.mxu0 %v3813_v49  ;;  %v3906_v49 = vld [vmem:[#allocation5 + $0x5b0] ss:$24 sps:$4 sm:$0xff]  }
  0xdd   :  { %2067 = vmatprep.subr.bf16.mxu0 %v3821_v50  ;;  %v3914_v50 = vld [vmem:[#allocation5 + $0x584] ss:$24 sps:$4 sm:$0xff]  }
  0xde   :  { %2109 = vmatpush2.bf16.msra.mxu1 %v3816_v52  ;;  %v3909_v52 = vld [vmem:[#allocation5 + $0x280] ss:$24 sps:$4 sm:$0xff]  }
  0xdf   :  { %2110 = vmatprep.subr.bf16.mxu1 %v3824_v53  ;;  %v3917_v53 = vld [vmem:[#allocation5 + $0x254] ss:$24 sps:$4 sm:$0xff]  }
  0xe0   :  { %2068 = vmatpush2.bf16.msra.mxu0 %v3819_v54  ;;  %v3912_v54 = vld [vmem:[#allocation5 + $0x580] ss:$24 sps:$4 sm:$0xff]  }
  0xe1   :  { %2069 = vmatprep.subr.bf16.mxu0 %v3827_v55  ;;  %v3920_v55 = vld [vmem:[#allocation5 + $0x554] ss:$24 sps:$4 sm:$0xff]  }
  0xe2   :  { %2111 = vmatpush2.bf16.msra.mxu1 %v3822_v56  ;;  %v3915_v56 = vld [vmem:[#allocation5 + $0x250] ss:$24 sps:$4 sm:$0xff]  }
  0xe3   :  { %2112 = vmatprep.subr.bf16.mxu1 %v3830_v57  ;;  %v3923_v57 = vld [vmem:[#allocation5 + $0x224] ss:$24 sps:$4 sm:$0xff]  }
  0xe4   :  { %2070 = vmatpush2.bf16.msra.mxu0 %v3825_v58  ;;  %v3918_v58 = vld [vmem:[#allocation5 + $0x550] ss:$24 sps:$4 sm:$0xff]  }
  0xe5   :  { %2071 = vmatprep.subr.bf16.mxu0 %v3833_v59  ;;  %v3926_v59 = vld [vmem:[#allocation5 + $0x524] ss:$24 sps:$4 sm:$0xff]  }
  0xe6   :  { %2113 = vmatpush2.bf16.msra.mxu1 %v3828_v60  ;;  %v3921_v60 = vld [vmem:[#allocation5 + $0x220] ss:$24 sps:$4 sm:$0xff]  }
  0xe7   :  { %2114 = vmatprep.subr.bf16.mxu1 %v3836_v61  ;;  %v3929_v61 = vld [vmem:[#allocation5 + $0x1f4] ss:$24 sps:$4 sm:$0xff]  }
  0xe8   :  { %2072 = vmatpush2.bf16.msra.mxu0 %v3831_v62  ;;  %v3924_v62 = vld [vmem:[#allocation5 + $0x520] ss:$24 sps:$4 sm:$0xff]  }
  0xe9   :  { %2073 = vmatprep.subr.bf16.mxu0 %v3839_v63  ;;  %v3932_v63 = vld [vmem:[#allocation5 + $0x4f4] ss:$24 sps:$4 sm:$0xff]  }
  0xea   :  { %2115 = vmatpush2.bf16.msra.mxu1 %v3834_v0  ;;  %v3927_v0 = vld [vmem:[#allocation5 + $0x1f0] ss:$24 sps:$4 sm:$0xff]  }
  0xeb   :  { %2116 = vmatprep.subr.bf16.mxu1 %v3842_v1  ;;  %v3935_v1 = vld [vmem:[#allocation5 + $0x1c4] ss:$24 sps:$4 sm:$0xff]  }
  0xec   :  { %2074 = vmatpush2.bf16.msra.mxu0 %v3837_v2  ;;  %v3930_v2 = vld [vmem:[#allocation5 + $0x4f0] ss:$24 sps:$4 sm:$0xff]  }
  0xed   :  { %2075 = vmatprep.subr.bf16.mxu0 %v3845_v4  ;;  %v3938_v4 = vld [vmem:[#allocation5 + $0x4c4] ss:$24 sps:$4 sm:$0xff]  }
  0xee   :  { %2117 = vmatpush2.bf16.msra.mxu1 %v3840_v5  ;;  %v3933_v5 = vld [vmem:[#allocation5 + $0x1c0] ss:$24 sps:$4 sm:$0xff]  }
  0xef   :  { %2118 = vmatprep.subr.bf16.mxu1 %v3848_v7  ;;  %v3941_v7 = vld [vmem:[#allocation5 + $0x194] ss:$24 sps:$4 sm:$0xff]  }
  0xf0   :  { %2076 = vmatpush2.bf16.msra.mxu0 %v3843_v8  ;;  %v3936_v8 = vld [vmem:[#allocation5 + $0x4c0] ss:$24 sps:$4 sm:$0xff]  }
  0xf1   :  { %2131 = vmatprep.subr.bf16.mxu0 %v3851_v10  ;;  %v3944_v10 = vld [vmem:[#allocation5 + $0x494] ss:$24 sps:$4 sm:$0xff]  }
  0xf2   :  { %2119 = vmatpush2.bf16.msra.mxu1 %v3846_v11  ;;  %v3939_v11 = vld [vmem:[#allocation5 + $0x190] ss:$24 sps:$4 sm:$0xff]  }
  0xf3   :  { %2078 = vmatmul.mubr.bf16.vlgmr.msra.gmra.mxu0 %v4260_v6  ;;  %2174 = vmatprep.subr.bf16.mxu1 %v3854_v12  ;;  %v3864_v6 = vld [vmem:[#allocation5 + $0x400] ss:$24 sps:$4 sm:$0xff]   ;;  %v3947_v12 = vld [vmem:[#allocation5 + $0x764] ss:$24 sps:$4 sm:$0xff]  }
  0xf4   :  { %2132 = vmatpush1.bf16.msra.mxu0 %v3849_v13  ;;  %2163 = vmatprep.mubr.bf16.mxu0 %v4093_v20  ;;  %v3942_v13 = vld [vmem:[#allocation5 + $0x490] ss:$24 sps:$4 sm:$0xff]   ;;  %v3953_v20 = vld [vmem:[#allocation5 + $0x704] ss:$24 sps:$4 sm:$0xff]  }
  0xf5   :  { %2121 = vmatmul.mubr.bf16.vlgmr.msra.gmra.mxu1 %v4267_v9  ;;  %2133 = vmatprep.subr.bf16.mxu0 %v3857_v14  ;;  %v3878_v9 = vld [vmem:[#allocation5 + $0x3a4] ss:$24 sps:$4 sm:$0xff]   ;;  %v3945_v14 = vld [vmem:[#allocation5 + $0x760] ss:$24 sps:$4 sm:$0xff]  }
  0xf6   :  { %2175 = vmatpush1.bf16.msra.mxu1 %v3852_v15  ;;  %2206 = vmatprep.mubr.bf16.mxu1 %v4094_v51  ;;  %v3950_v15 = vld [vmem:[#allocation5 + $0x734] ss:$24 sps:$4 sm:$0xff]   ;;  %v3954_v51 = vld [vmem:[#allocation5 + $0x6d0] ss:$24 sps:$4 sm:$0xff]  }
  0xf7   :  { %2176 = vmatprep.subr.bf16.mxu1 %v3860_v17  ;;  %v3948_v17 = vld [vmem:[#allocation5 + $0x730] ss:$24 sps:$4 sm:$0xff]  }
  0xf8   :  { %2134 = vmatpush1.bf16.msra.mxu0 %v3855_v16  ;;  %v4095_v16 = vld [vmem:[#allocation2] ss:$24 sps:$4 sm:$0xff]  }
  0xf9   :  { %2135 = vmatprep.subr.bf16.mxu0 %v3863_v19  ;;  %v4097_v19 = vld [vmem:[#allocation2 + $0x8] ss:$24 sps:$4 sm:$0xff]  }
  0xfa   :  { %2177 = vmatpush1.bf16.msra.mxu1 %v3858_v18  ;;  %v4096_v18 = vld [vmem:[#allocation2 + $0x14] ss:$24 sps:$4 sm:$0xff]  }
  0xfb   :  { %2178 = vmatprep.subr.bf16.mxu1 %v3866_v21  ;;  %v3951_v21 = vld [vmem:[#allocation5 + $0x700] ss:$24 sps:$4 sm:$0xff]  }
  0xfc   :  { %2136 = vmatpush1.bf16.msra.mxu0 %v3861_v22  ;;  %v3956_v22 = vld [vmem:[#allocation5 + $0x6d4] ss:$24 sps:$4 sm:$0xff]  }
  0xfd   :  { %2137 = vmatprep.subr.bf16.mxu0 %v3869_v3  ;;  %v3959_v3 = vld [vmem:[#allocation5 + $0x6a4] ss:$24 sps:$4 sm:$0xff]  }
  0xfe   :  { %2179 = vmatpush1.bf16.msra.mxu1 %v3864_v6  ;;  %v3957_v6 = vld [vmem:[#allocation5 + $0x6a0] ss:$24 sps:$4 sm:$0xff]  }
  0xff   :  { %2180 = vmatprep.subr.bf16.mxu1 %v3872_v23  ;;  %v3962_v23 = vld [vmem:[#allocation5 + $0x674] ss:$24 sps:$4 sm:$0xff]  }
 0x100   :  { %2138 = vmatpush1.bf16.msra.mxu0 %v3867_v24  ;;  %v3960_v24 = vld [vmem:[#allocation5 + $0x670] ss:$24 sps:$4 sm:$0xff]  }
 0x101   :  { %2139 = vmatprep.subr.bf16.mxu0 %v3875_v25  ;;  %v3965_v25 = vld [vmem:[#allocation5 + $0x644] ss:$24 sps:$4 sm:$0xff]  }
 0x102   :  { %2181 = vmatpush1.bf16.msra.mxu1 %v3870_v26  ;;  %v3963_v26 = vld [vmem:[#allocation5 + $0x640] ss:$24 sps:$4 sm:$0xff]  }
 0x103   :  { %2182 = vmatprep.subr.bf16.mxu1 %v3878_v9  ;;  %v3968_v9 = vld [vmem:[#allocation5 + $0x614] ss:$24 sps:$4 sm:$0xff]  }
 0x104   :  { %2140 = vmatpush1.bf16.msra.mxu0 %v3873_v27  ;;  %v3966_v27 = vld [vmem:[#allocation5 + $0x610] ss:$24 sps:$4 sm:$0xff]  }
 0x105   :  { %2141 = vmatprep.subr.bf16.mxu0 %v3881_v28  ;;  %v3971_v28 = vld [vmem:[#allocation5 + $0x8e4] ss:$24 sps:$4 sm:$0xff]  }
 0x106   :  { %2183 = vmatpush1.bf16.msra.mxu1 %v3876_v29  ;;  %v3969_v29 = vld [vmem:[#allocation5 + $0x8e0] ss:$24 sps:$4 sm:$0xff]  }
 0x107   :  { %2184 = vmatprep.subr.bf16.mxu1 %v3884_v30  ;;  %v3974_v30 = vld [vmem:[#allocation5 + $0x8b4] ss:$24 sps:$4 sm:$0xff]  }
 0x108   :  { %2142 = vmatpush1.bf16.msra.mxu0 %v3879_v31  ;;  %v3972_v31 = vld [vmem:[#allocation5 + $0x8b0] ss:$24 sps:$4 sm:$0xff]  }
 0x109   :  { %2143 = vmatprep.subr.bf16.mxu0 %v3887_v32  ;;  %v3977_v32 = vld [vmem:[#allocation5 + $0x884] ss:$24 sps:$4 sm:$0xff]  }
 0x10a   :  { %2185 = vmatpush1.bf16.msra.mxu1 %v3882_v33  ;;  %v3975_v33 = vld [vmem:[#allocation5 + $0x880] ss:$24 sps:$4 sm:$0xff]  }
 0x10b   :  { %2186 = vmatprep.subr.bf16.mxu1 %v3890_v34  ;;  %v3980_v34 = vld [vmem:[#allocation5 + $0x854] ss:$24 sps:$4 sm:$0xff]  }
 0x10c   :  { %2144 = vmatpush1.bf16.msra.mxu0 %v3885_v35  ;;  %v3978_v35 = vld [vmem:[#allocation5 + $0x850] ss:$24 sps:$4 sm:$0xff]  }
 0x10d   :  { %2145 = vmatprep.subr.bf16.mxu0 %v3893_v36  ;;  %v3983_v36 = vld [vmem:[#allocation5 + $0x824] ss:$24 sps:$4 sm:$0xff]  }
 0x10e   :  { %2187 = vmatpush1.bf16.msra.mxu1 %v3888_v37  ;;  %v3981_v37 = vld [vmem:[#allocation5 + $0x820] ss:$24 sps:$4 sm:$0xff]  }
 0x10f   :  { %2188 = vmatprep.subr.bf16.mxu1 %v3896_v38  ;;  %v3986_v38 = vld [vmem:[#allocation5 + $0x7f4] ss:$24 sps:$4 sm:$0xff]  }
 0x110   :  { %2146 = vmatpush1.bf16.msra.mxu0 %v3891_v39  ;;  %v3984_v39 = vld [vmem:[#allocation5 + $0x7f0] ss:$24 sps:$4 sm:$0xff]  }
 0x111   :  { %2147 = vmatprep.subr.bf16.mxu0 %v3899_v40  ;;  %v3989_v40 = vld [vmem:[#allocation5 + $0x7c4] ss:$24 sps:$4 sm:$0xff]  }
 0x112   :  { %2189 = vmatpush1.bf16.msra.mxu1 %v3894_v41  ;;  %v3987_v41 = vld [vmem:[#allocation5 + $0x7c0] ss:$24 sps:$4 sm:$0xff]  }
 0x113   :  { %2190 = vmatprep.subr.bf16.mxu1 %v3902_v42  ;;  %v3992_v42 = vld [vmem:[#allocation5 + $0x794] ss:$24 sps:$4 sm:$0xff]  }
 0x114   :  { %2148 = vmatpush2.bf16.msra.mxu0 %v3897_v43  ;;  %v3990_v43 = vld [vmem:[#allocation5 + $0x790] ss:$24 sps:$4 sm:$0xff]  }
 0x115   :  { %2149 = vmatprep.subr.bf16.mxu0 %v3905_v44  ;;  %v4098_v44 = vld [vmem:[#allocation2 + $0x10] ss:$24 sps:$4 sm:$0xff]  }
 0x116   :  { %2191 = vmatpush2.bf16.msra.mxu1 %v3900_v45 }
 0x117   :  { %2192 = vmatprep.subr.bf16.mxu1 %v3908_v46 }
 0x118   :  { %2150 = vmatpush2.bf16.msra.mxu0 %v3903_v47 }
 0x119   :  { %2151 = vmatprep.subr.bf16.mxu0 %v3911_v48 }
 0x11a   :  { %2193 = vmatpush2.bf16.msra.mxu1 %v3906_v49 }
 0x11b   :  { %2194 = vmatprep.subr.bf16.mxu1 %v3914_v50 }
 0x11c   :  { %2152 = vmatpush2.bf16.msra.mxu0 %v3909_v52  ;;  %v373_v52 = vlaneseq }
 0x11d   :  { %2153 = vmatprep.subr.bf16.mxu0 %v3917_v53 }
 0x11e   :  { %2195 = vmatpush2.bf16.msra.mxu1 %v3912_v54 }
 0x11f   :  { %2196 = vmatprep.subr.bf16.mxu1 %v3920_v55 }
 0x120   :  { %2154 = vmatpush2.bf16.msra.mxu0 %v3915_v56  ;;  %v374_v56 = vshrl.u32 %v373_v52, 7 }
 0x121   :  { %2155 = vmatprep.subr.bf16.mxu0 %v3923_v57 }
 0x122   :  { %2197 = vmatpush2.bf16.msra.mxu1 %v3918_v58 }
 0x123   :  { %2198 = vmatprep.subr.bf16.mxu1 %v3926_v59  ;;  %v4275_v59 = vsub.s32 0, %v374_v56 }
 0x124   :  { %2156 = vmatpush2.bf16.msra.mxu0 %v3921_v60 }
 0x125   :  { %2157 = vmatprep.subr.bf16.mxu0 %v3929_v61  ;;  %v72_v61 = vld [vmem:[#allocation7] ss:$4 sm:$0x3f] }
 0x126   :  { %2199 = vmatpush2.bf16.msra.mxu1 %v3924_v62  ;;  %v4277_v62 = vsub.s32 1, %v374_v56 }
 0x127   :  { %2200 = vmatprep.subr.bf16.mxu1 %v3932_v63 }
 0x128   :  { %2158 = vmatpush2.bf16.msra.mxu0 %v3927_v0  ;;  %v4279_v0 = vsub.s32 2, %v374_v56 }
 0x129   :  { %2159 = vmatprep.subr.bf16.mxu0 %v3935_v1  ;;  %v376_v1 = vrot.slane %v72_v61, %v4275_v59 }
 0x12a   :  { %2201 = vmatpush2.bf16.msra.mxu1 %v3930_v2 }
 0x12b   :  { %2202 = vmatprep.subr.bf16.mxu1 %v3938_v4  ;;  %v380_v4 = vrot.slane %v72_v61, %v4277_v62 }
 0x12c   :  { %2160 = vmatpush2.bf16.msra.mxu0 %v3933_v5 }
 0x12d   :  { %2161 = vmatprep.subr.bf16.mxu0 %v3941_v7  ;;  %v384_v7 = vrot.slane %v72_v61, %v4279_v0 }
 0x12e   :  { %2203 = vmatpush2.bf16.msra.mxu1 %v3936_v8  ;;  %v4284_v8 = vsub.s32 3, %v374_v56 }
 0x12f   :  { %2204 = vmatprep.subr.bf16.mxu1 %v3944_v10 }
 0x130   :  { %2162 = vmatpush2.bf16.msra.mxu0 %v3939_v11 }
 0x131   :  { %2217 = vmatprep.subr.bf16.mxu0 %v3947_v12 }
 0x132   :  { %2205 = vmatpush2.bf16.msra.mxu1 %v3942_v13 }
 0x133   :  { %2164 = vmatmul.mubr.bf16.vlgmr.msra.gmra.mxu0 %v4095_v16  ;;  %v1907_v45 = vpop.f32.mrf.mxu0 }
 0x134   :  { %2218 = vmatpush1.bf16.msra.mxu0 %v3945_v14  ;;  %2249 = vmatprep.mubr.bf16.mxu0 %v4096_v18  ;;  %v1950_v46 = vpop.f32.mrf.mxu1  ;;  %v1908_v10 = vadd.f32 %v1907_v45, %v376_v1 }
 0x135   :  { %2207 = vmatmul.mubr.bf16.vlgmr.msra.gmra.mxu1 %v4097_v19  ;;  %2219 = vmatprep.subr.bf16.mxu0 %v3950_v15  ;;  %v1909_v47 = vpop.f32.mrf.mxu0  ;;  %v388_v15 = vrot.slane %v72_v61, %v4284_v8 }
 0x136   :  { %v1952_v48 = vpop.f32.mrf.mxu1  ;;  %v1910_v13 = vadd.f32 %v1909_v47, %v380_v4  ;;  %v1951_v16 = vadd.f32 %v1950_v46, %v1908_v10  ;;  %v4308_v46 = vsub.s32 5, %v374_v56 }
 0x137   :  { %v1911_v49 = vpop.f32.mrf.mxu0 }
 0x138   :  { %2220 = vmatpush1.bf16.msra.mxu0 %v3948_v17  ;;  %v1954_v50 = vpop.f32.mrf.mxu1  ;;  %v1912_v19 = vadd.f32 %v1911_v49, %v376_v1 }
 0x139   :  { %2221 = vmatprep.subr.bf16.mxu0 %v3953_v20  ;;  %v1913_v53 = vpop.f32.mrf.mxu0  ;;  %v1953_v20 = vadd.f32 %v1952_v48, %v1910_v13 }
 0x13a   :  { %v1956_v54 = vpop.f32.mrf.mxu1 }
 0x13c   :  { %2222 = vmatpush1.bf16.msra.mxu0 %v3951_v21 }
 0x13d   :  { %2223 = vmatprep.subr.bf16.mxu0 %v3956_v22 }
 0x140   :  { %2224 = vmatpush1.bf16.msra.mxu0 %v3954_v51 }
 0x141   :  { %2225 = vmatprep.subr.bf16.mxu0 %v3959_v3  ;;  %v1914_v3 = vadd.f32 %v1913_v53, %v380_v4 }
 0x144   :  { %2226 = vmatpush1.bf16.msra.mxu0 %v3957_v6 }
 0x145   :  { %2227 = vmatprep.subr.bf16.mxu0 %v3962_v23 }
 0x148   :  { %2228 = vmatpush1.bf16.msra.mxu0 %v3960_v24 }
 0x149   :  { %2229 = vmatprep.subr.bf16.mxu0 %v3965_v25 }
 0x14c   :  { %2230 = vmatpush1.bf16.msra.mxu0 %v3963_v26  ;;  %v1955_v26 = vadd.f32 %v1954_v50, %v1912_v19 }
 0x14d   :  { %2231 = vmatprep.subr.bf16.mxu0 %v3968_v9 }
 0x150   :  { %2232 = vmatpush1.bf16.msra.mxu0 %v3966_v27 }
 0x151   :  { %2233 = vmatprep.subr.bf16.mxu0 %v3971_v28 }
 0x154   :  { %2234 = vmatpush2.bf16.msra.mxu0 %v3969_v29  ;;  %v1957_v29 = vadd.f32 %v1956_v54, %v1914_v3  ;;  %v396_v54 = vrot.slane %v72_v61, %v4308_v46 }
 0x155   :  { %2235 = vmatprep.subr.bf16.mxu0 %v3974_v30 }
 0x158   :  { %2236 = vmatpush2.bf16.msra.mxu0 %v3972_v31 }
 0x159   :  { %2237 = vmatprep.subr.bf16.mxu0 %v3977_v32 }
 0x15c   :  { %2238 = vmatpush2.bf16.msra.mxu0 %v3975_v33 }
 0x15d   :  { %2239 = vmatprep.subr.bf16.mxu0 %v3980_v34 }
 0x160   :  { %2240 = vmatpush2.bf16.msra.mxu0 %v3978_v35 }
 0x161   :  { %2241 = vmatprep.subr.bf16.mxu0 %v3983_v36 }
 0x164   :  { %2242 = vmatpush2.bf16.msra.mxu0 %v3981_v37 }
 0x165   :  { %2243 = vmatprep.subr.bf16.mxu0 %v3986_v38 }
 0x168   :  { %2244 = vmatpush2.bf16.msra.mxu0 %v3984_v39 }
 0x169   :  { %2245 = vmatprep.subr.bf16.mxu0 %v3989_v40 }
 0x16c   :  { %2246 = vmatpush2.bf16.msra.mxu0 %v3987_v41 }
 0x16d   :  { %2247 = vmatprep.subr.bf16.mxu0 %v3992_v42  ;;  %v4304_v42 = vsub.s32 4, %v374_v56 }
 0x16f   :  { %v392_v53 = vrot.slane %v72_v61, %v4304_v42 }
 0x170   :  { %2248 = vmatpush2.bf16.msra.mxu0 %v3990_v43 }
 0x173   :  { %2250 = vmatmul.mubr.bf16.vlgmr.msra.gmra.mxu0 %v4098_v44  ;;  %v1993_v55 = vpop.f32.mrf.mxu0 }
 0x174   :  { %v4287_v21 = vadd.f32 %v1993_v55, %v1951_v16 }
 0x175   :  { %v2036_v57 = vpop.f32.mrf.mxu1  ;;  %v1995_v58 = vpop.f32.mrf.mxu0 }
 0x176   :  { %v2037_v14 = vadd.f32 %v2036_v57, %v384_v7  ;;  %v4289_v6 = vadd.f32 %v1995_v58, %v1953_v20  ;;  %v3414_v9 = vmul.f32 -1.442695, %v4287_v21 }
 0x177   :  { %v2038_v60 = vpop.f32.mrf.mxu1  ;;  %v1997_v63 = vpop.f32.mrf.mxu0 }
 0x178   :  { %v2039_v22 = vadd.f32 %v2038_v60, %v388_v15  ;;  %v3415_v31 = vmul.f32 -1.442695, %v4289_v6  ;;  %v4295_v32 = vadd.f32 %v1997_v63, %v1955_v26  ;;  %4041 = vpow2.f32 %v3414_v9 }
 0x179   :  { %v2040_v2 = vpop.f32.mrf.mxu1  ;;  %v1999_v5 = vpop.f32.mrf.mxu0 }
 0x17a   :  { %v2041_v25 = vadd.f32 %v2040_v2, %v384_v7  ;;  %v4297_v35 = vadd.f32 %v1999_v5, %v1957_v29  ;;  %4043 = vpow2.f32 %v3415_v31  ;;  %v3420_v43 = vmul.f32 -1.442695, %v4295_v32 }
 0x17b   :  { %v2042_v11 = vpop.f32.mrf.mxu1 }
 0x17c   :  { %v2043_v36 = vadd.f32 %v2042_v11, %v388_v15  ;;  %v3421_v45 = vmul.f32 -1.442695, %v4297_v35 }
 0x185   :  { %v4042_v2 = vpop.eup %4041 }
 0x186   :  { %v2296_v61 = vadd.f32 1.0, %v4042_v2 }
 0x187   :  { %v4044_v10 = vpop.eup %4043 }
 0x188   :  { %v2297_v20 = vadd.f32 1.0, %v4044_v10 }
 0x1b3   :  { %v2079_v12 = vpop.f32.mrf.mxu0 }
 0x1b4   :  { %v2080_v51 = vadd.f32 %v2079_v12, %v2037_v14 }
 0x1b5   :  { %v2081_v17 = vpop.f32.mrf.mxu0  ;;  %v2122_v18 = vpop.f32.mrf.mxu1 }
 0x1b6   :  { %v2082_v27 = vadd.f32 %v2081_v17, %v2039_v22  ;;  %v4292_v28 = vadd.f32 %v2122_v18, %v2080_v51 }
 0x1b7   :  { %v2083_v23 = vpop.f32.mrf.mxu0  ;;  %v2124_v24 = vpop.f32.mrf.mxu1 }
 0x1b8   :  { %v2084_v30 = vadd.f32 %v2083_v23, %v2041_v25  ;;  %v3416_v37 = vmul.f32 -1.442695, %v4292_v28  ;;  %v4300_v38 = vadd.f32 %v2124_v24, %v2082_v27 }
 0x1b9   :  { %v2085_v33 = vpop.f32.mrf.mxu0  ;;  %v2126_v34 = vpop.f32.mrf.mxu1 }
 0x1ba   :  { %v2086_v40 = vadd.f32 %v2085_v33, %v2043_v36  ;;  %v4302_v41 = vadd.f32 %v2126_v34, %v2084_v30  ;;  %4045 = vpow2.f32 %v3416_v37  ;;  %v3417_v47 = vmul.f32 -1.442695, %v4300_v38 }
 0x1bb   :  { %v2128_v44 = vpop.f32.mrf.mxu1  ;;  %4047 = vpow2.f32 %v3420_v43 }
 0x1bc   :  { %v3422_v50 = vmul.f32 -1.442695, %v4302_v41  ;;  %v4312_v52 = vadd.f32 %v2128_v44, %v2086_v40  ;;  %4049 = vpow2.f32 %v3421_v45 }
 0x1bd   :  { %4051 = vpow2.f32 %v3417_v47 }
 0x1be   :  { %4053 = vpow2.f32 %v3422_v50  ;;  %v3423_v56 = vmul.f32 -1.442695, %v4312_v52 }
 0x1c0   :  { %4055 = vpow2.f32 %v3423_v56 }
 0x1c7   :  { %v4046_v16 = vpop.eup %4045 }
 0x1c8   :  { %v4048_v51 = vpop.eup %4047  ;;  %v2298_v26 = vadd.f32 1.0, %v4046_v16 }
 0x1c9   :  { %v4050_v25 = vpop.eup %4049  ;;  %v2302_v33 = vadd.f32 1.0, %v4048_v51 }
 0x1ca   :  { %v4052_v27 = vpop.eup %4051  ;;  %v2303_v34 = vadd.f32 1.0, %v4050_v25 }
 0x1cb   :  { %v4054_v31 = vpop.eup %4053  ;;  %v2299_v37 = vadd.f32 1.0, %v4052_v27  ;;  %v3995_v27 = vld [vmem:[#allocation8 + $0x178] sm:$0xff]  }
 0x1cc   :  { %3519 = vmatprep.subr.bf16.mxu0 %v3995_v27  ;;  %v4009_v27 = vld [vmem:[#allocation8 + $0x58] sm:$0xff]  }
 0x1cd   :  { %v4056_v40 = vpop.eup %4055 }
 0x1ce   :  { %v2305_v43 = vadd.f32 1.0, %v4056_v40 }
 0x1f3   :  { %v2165_v39 = vpop.f32.mrf.mxu0 }
 0x1f4   :  { %v2166_v58 = vadd.f32 %v2165_v39, %v392_v53  ;;  %v2304_v39 = vadd.f32 1.0, %v4054_v31 }
 0x1f5   :  { %v2167_v48 = vpop.f32.mrf.mxu0  ;;  %v2208_v49 = vpop.f32.mrf.mxu1 }
 0x1f6   :  { %v2168_v60 = vadd.f32 %v2167_v48, %v396_v54  ;;  %v2209_v4 = vadd.f32 %v2208_v49, %v2166_v58 }
 0x1f7   :  { %v2169_v55 = vpop.f32.mrf.mxu0  ;;  %v2210_v57 = vpop.f32.mrf.mxu1 }
 0x1f8   :  { %v2170_v5 = vadd.f32 %v2169_v55, %v392_v53  ;;  %v2211_v11 = vadd.f32 %v2210_v57, %v2168_v60 }
 0x1f9   :  { %v2171_v63 = vpop.f32.mrf.mxu0  ;;  %v2212_v1 = vpop.f32.mrf.mxu1 }
 0x1fa   :  { %v2172_v12 = vadd.f32 %v2171_v63, %v396_v54  ;;  %v2213_v17 = vadd.f32 %v2212_v1, %v2170_v5 }
 0x1fb   :  { %v2214_v14 = vpop.f32.mrf.mxu1 }
 0x1fc   :  { %v2215_v3 = vadd.f32 %v2214_v14, %v2172_v12 }
 0x233   :  { %v2251_v7 = vpop.f32.mrf.mxu0 }
 0x234   :  { %v4317_v13 = vadd.f32 %v2251_v7, %v2209_v4 }
 0x235   :  { %v2253_v15 = vpop.f32.mrf.mxu0 }
 0x236   :  { %v3418_v18 = vmul.f32 -1.442695, %v4317_v13  ;;  %v4320_v19 = vadd.f32 %v2253_v15, %v2211_v11 }
 0x237   :  { %v2255_v22 = vpop.f32.mrf.mxu0 }
 0x238   :  { %4057 = vpow2.f32 %v3418_v18  ;;  %v3419_v23 = vmul.f32 -1.442695, %v4320_v19  ;;  %v4323_v24 = vadd.f32 %v2255_v22, %v2213_v17 }
 0x239   :  { %4059 = vrcp.f32 %v2296_v61  ;;  %v2257_v9 = vpop.f32.mrf.mxu0 }
 0x23a   :  { %4061 = vpow2.f32 %v3419_v23  ;;  %v3424_v29 = vmul.f32 -1.442695, %v4323_v24  ;;  %v2258_v30 = vadd.f32 %v2257_v9, %v2215_v3  ;;  %v3993_v9 = vld [vmem:[#allocation8 + $0x78] sm:$0xff]  }
 0x23b   :  { %4063 = vrcp.f32 %v2297_v20  ;;  %3475 = vmatprep.subr.bf16.mxu1 %v3993_v9  ;;  %v4007_v9 = vld [vmem:[#allocation8 + $0x160] sm:$0xff]  }
 0x23c   :  { %4065 = vpow2.f32 %v3424_v29  ;;  %v3425_v36 = vmul.f32 -1.442695, %v2258_v30 }
 0x23d   :  { %4067 = vrcp.f32 %v2298_v26 }
 0x23e   :  { %4069 = vpow2.f32 %v3425_v36 }
 0x23f   :  { %4071 = vrcp.f32 %v2302_v33 }
 0x240   :  { %4073 = vrcp.f32 %v2303_v34 }
 0x241   :  { %4075 = vrcp.f32 %v2299_v37 }
 0x242   :  { %4077 = vrcp.f32 %v2304_v39 }
 0x243   :  { %4079 = vrcp.f32 %v2305_v43 }
 0x245   :  { %v4058_v44 = vpop.eup %4057 }
 0x246   :  { %v4060_v45 = vpop.eup %4059  ;;  %v2300_v47 = vadd.f32 1.0, %v4058_v44 }
 0x247   :  { %v4062_v48 = vpop.eup %4061  ;;  %v2332_v2 = vmul.f32 %v4060_v45, %v4287_v21 }
 0x248   :  { %v4064_v49 = vpop.eup %4063  ;;  %4081 = vrcp.f32 %v2300_v47  ;;  %v2301_v50 = vadd.f32 1.0, %v4062_v48 }
 0x249   :  { %v4066_v53 = vpop.eup %4065  ;;  %v2333_v58 = vmul.f32 %v4064_v49, %v4289_v6 }
 0x24a   :  { %v4068_v54 = vpop.eup %4067  ;;  %4083 = vrcp.f32 %v2301_v50  ;;  %v2306_v55 = vadd.f32 1.0, %v4066_v53 }
 0x24b   :  { %v4070_v57 = vpop.eup %4069  ;;  %v2334_v4 = vmul.f32 %v4068_v54, %v4292_v28  ;;  %v2344_v7 = vadd.f32 %v2333_v58, %v2332_v2 }
 0x24c   :  { %v4072_v56 = vpop.eup %4071  ;;  %4085 = vrcp.f32 %v2306_v55  ;;  %v2307_v60 = vadd.f32 1.0, %v4070_v57 }
 0x24d   :  { %v4074_v63 = vpop.eup %4073  ;;  %v2338_v11 = vmul.f32 %v4072_v56, %v4295_v32  ;;  %v2345_v12 = vadd.f32 %v2344_v7, %v2334_v4 }
 0x24e   :  { %v4076_v1 = vpop.eup %4075  ;;  %4087 = vrcp.f32 %v2307_v60  ;;  %v2339_v10 = vmul.f32 %v4074_v63, %v4297_v35 }
 0x24f   :  { %v4078_v5 = vpop.eup %4077  ;;  %v2335_v61 = vmul.f32 %v4076_v1, %v4300_v38 }
 0x250   :  { %v2340_v6 = vmul.f32 %v4078_v5, %v4302_v41  ;;  %v4080_v14 = vpop.eup %4079  ;;  %v2351_v15 = vadd.f32 %v2339_v10, %v2338_v11 }
 0x251   :  { %v2341_v21 = vmul.f32 %v4080_v14, %v4312_v52  ;;  %v2346_v18 = vadd.f32 %v2345_v12, %v2335_v61  ;;  %v3994_v52 = vld [vmem:[#allocation8 + $0x38] sm:$0xff]  }
 0x252   :  { %v2352_v17 = vadd.f32 %v2351_v15, %v2340_v6  ;;  %3476 = vmatpush3.bf16.msra.mxu1 %v3994_v52  ;;  %v4008_v52 = vld [vmem:[#allocation8 + $0x120] sm:$0xff]  }
 0x254   :  { %v2353_v32 = vadd.f32 %v2352_v17, %v2341_v21 }
 0x255   :  { %v4082_v16 = vpop.eup %4081 }
 0x256   :  { %v2336_v28 = vmul.f32 %v4082_v16, %v4317_v13 }
 0x257   :  { %v4084_v20 = vpop.eup %4083 }
 0x258   :  { %v2337_v22 = vmul.f32 %v4084_v20, %v4320_v19  ;;  %v2347_v35 = vadd.f32 %v2346_v18, %v2336_v28  ;;  %v3996_v20 = vld [vmem:[#allocation8 + $0x138] sm:$0xff]  }
 0x259   :  { %v4086_v51 = vpop.eup %4085  ;;  %3520 = vmatpush3.bf16.msra.mxu0 %v3996_v20 }
 0x25a   :  { %v2342_v3 = vmul.f32 %v4086_v51, %v4323_v24  ;;  %v2348_v38 = vadd.f32 %v2347_v35, %v2337_v22  ;;  %v3998_v35 = vld [vmem:[#allocation8 + $0x30] sm:$0xff]  }
 0x25b   :  { %v4088_v23 = vpop.eup %4087  ;;  %v3999_v51 = vld [vmem:[#allocation8 + $0x170] sm:$0xff]  }
 0x25c   :  { %v2343_v41 = vmul.f32 %v4088_v23, %v2258_v30  ;;  %2349 = vadd.xlane.f32.xlu0 %v2348_v38  ;;  %v2354_v25 = vadd.f32 %v2353_v32, %v2342_v3  ;;  %v4000_v32 = vld [vmem:[#allocation8 + $0x130] sm:$0xff]   ;;  %3521 = vmatprep.subr.bf16.mxu0 %v3999_v51  ;;  %v4002_v38 = vld [vmem:[#allocation8 + $0x28] sm:$0xff]  }
 0x25d   :  { %3522 = vmatpush3.bf16.msra.mxu0 %v4000_v32  ;;  %v4003_v23 = vld [vmem:[#allocation8 + $0x168] sm:$0xff]  }
 0x25e   :  { %v2355_v26 = vadd.f32 %v2354_v25, %v2343_v41  ;;  %3523 = vmatprep.subr.bf16.mxu0 %v4003_v23  ;;  %v4005_v25 = vld [vmem:[#allocation8 + $0x60] sm:$0xff]  }
 0x260   :  { %2356 = vadd.xlane.f32.xlu0 %v2355_v26  ;;  %v4006_v26 = vld [vmem:[#allocation8 + $0x20] sm:$0xff]  }
 0x2e5   :  { %v2350_v13 = vpop.xlane.xlu0 %2349 }
 0x2e6   :  { %v2359_v19 = vmul.f32 0.0013020834, %v2350_v13  ;;  %v4010_v13 = vld [vmem:[#allocation8 + $0x18] sm:$0xff]  }
 0x2e8   :  { %v4337_v29 = vsub.f32 %v2332_v2, %v2359_v19  ;;  %v4339_v31 = vsub.f32 %v2333_v58, %v2359_v19  ;;  %v4341_v24 = vsub.f32 %v2334_v4, %v2359_v19  ;;  %v4343_v34 = vsub.f32 %v2335_v61, %v2359_v19 }
 0x2e9   :  { %v2357_v33 = vpop.xlane.xlu0 %2356  ;;  %v4349_v39 = vsub.f32 %v2336_v28, %v2359_v19  ;;  %v4359_v48 = vsub.f32 %v2337_v22, %v2359_v19  ;;  %v3997_v22 = vld [vmem:[#allocation8 + $0x70] sm:$0xff]   ;;  %v4011_v19 = vld [vmem:[#allocation8 + $0x158] sm:$0xff]  }
 0x2ea   :  { %v2360_v30 = vmul.f32 0.0013020834, %v2357_v33  ;;  %v2373_v36 = vmul.f32 %v4337_v29, %v4337_v29  ;;  %v2374_v37 = vmul.f32 %v4339_v31, %v4339_v31  ;;  %v2375_v40 = vmul.f32 %v4341_v24, %v4341_v24  ;;  %3477 = vmatprep.subr.bf16.mxu1 %v3997_v22  ;;  %v4012_v33 = vld [vmem:[#allocation8 + $0x118] sm:$0xff]  }
 0x2eb   :  { %v2376_v54 = vmul.f32 %v4343_v34, %v4343_v34  ;;  %v2377_v58 = vmul.f32 %v4349_v39, %v4349_v39  ;;  %v2378_v12 = vmul.f32 %v4359_v48, %v4359_v48  ;;  %3478 = vmatpush3.bf16.msra.mxu1 %v3998_v35 }
 0x2ec   :  { %v2385_v43 = vadd.f32 %v2374_v37, %v2373_v36  ;;  %v4353_v44 = vsub.f32 %v2338_v11, %v2360_v30  ;;  %v4355_v45 = vsub.f32 %v2339_v10, %v2360_v30  ;;  %v4357_v47 = vsub.f32 %v2340_v6, %v2360_v30  ;;  %v4014_v36 = vld [vmem:[#allocation8 + $0x10] sm:$0xff]  }
 0x2ed   :  { %v4361_v49 = vsub.f32 %v2341_v21, %v2360_v30  ;;  %v4363_v50 = vsub.f32 %v2342_v3, %v2360_v30  ;;  %v4365_v53 = vsub.f32 %v2343_v41, %v2360_v30  ;;  %v4001_v3 = vld [vmem:[#allocation8 + $0x68] sm:$0xff]   ;;  %v4013_v30 = vld [vmem:[#allocation8 + $0x50] sm:$0xff]  }
 0x2ee   :  { %v2386_v55 = vadd.f32 %v2385_v43, %v2375_v40  ;;  %v2379_v57 = vmul.f32 %v4353_v44, %v4353_v44  ;;  %v2380_v56 = vmul.f32 %v4355_v45, %v4355_v45  ;;  %v2381_v60 = vmul.f32 %v4357_v47, %v4357_v47  ;;  %3479 = vmatprep.subr.bf16.mxu1 %v4001_v3  ;;  %v4004_v41 = vld [vmem:[#allocation8 + $0x128] sm:$0xff]   ;;  %v4015_v37 = vld [vmem:[#allocation8 + $0x150] sm:$0xff]  }
 0x2ef   :  { %v2409_v63 = vpack.c.bf16 %v4363_v50, %v4349_v39  ;;  %v2410_v4 = vpack.c.bf16 %v4365_v53, %v4359_v48  ;;  %v2406_v5 = vpack.c.bf16 %v4355_v45, %v4339_v31  ;;  %v2405_v7 = vpack.c.bf16 %v4353_v44, %v4337_v29  ;;  %3480 = vmatpush3.bf16.msra.mxu1 %v4002_v38  ;;  %v4016_v40 = vld [vmem:[#allocation8 + $0x110] sm:$0xff]   ;;  %v4017_v43 = vld [vmem:[#allocation8 + $0x48] sm:$0xff]  }
 0x2f0   :  { %v2387_v1 = vadd.f32 %v2386_v55, %v2376_v54  ;;  %v2392_v2 = vadd.f32 %v2380_v56, %v2379_v57  ;;  %v2408_v10 = vpack.c.bf16 %v4361_v49, %v4343_v34  ;;  %v2407_v11 = vpack.c.bf16 %v4357_v47, %v4341_v24  ;;  %3524 = vmatpush3.bf16.msra.mxu0 %v4004_v41  ;;  %v4018_v54 = vld [vmem:[#allocation8 + $0x8] sm:$0xff]   ;;  %v4021_v56 = vld [vmem:[#allocation8 + $0x40] sm:$0xff]  }
 0x2f1   :  { %v2382_v6 = vmul.f32 %v4361_v49, %v4361_v49  ;;  %v2383_v16 = vmul.f32 %v4363_v50, %v4363_v50  ;;  %v2384_v21 = vmul.f32 %v4365_v53, %v4365_v53  ;;  %3481 = vmatprep.subr.bf16.mxu1 %v4005_v25  ;;  %3525 = vmatprep.subr.bf16.mxu0 %v4007_v9  ;;  %v4019_v55 = vld [vmem:[#allocation8 + $0x148] sm:$0xff]   ;;  %v4027_v49 = vld [vmem:[#allocation8 + $0xf0] sm:$0xff]  }
 0x2f2   :  { %v2388_v61 = vadd.f32 %v2387_v1, %v2377_v58  ;;  %v2393_v14 = vadd.f32 %v2392_v2, %v2381_v60  ;;  %v4020_v57 = vld [vmem:[#allocation8 + $0x108] sm:$0xff]   ;;  %v4023_v58 = vld [vmem:[#allocation8 + $0x140] sm:$0xff]   ;;  %v4025_v2 = vld [vmem:[#allocation8 + $0xf8] sm:$0xff]  }
 0x2f3   :  { %3482 = vmatpush3.bf16.msra.mxu1 %v4006_v26  ;;  %v4022_v60 = vld [vmem:[#allocation8] sm:$0xff]   ;;  %v4029_v24 = vld [vmem:[#allocation8 + $0xe8] sm:$0xff]  }
 0x2f4   :  { %v2389_v15 = vadd.f32 %v2388_v61, %v2378_v12  ;;  %v2394_v17 = vadd.f32 %v2393_v14, %v2382_v6  ;;  %3526 = vmatpush3.bf16.msra.mxu0 %v4008_v52  ;;  %3483 = vmatprep.subr.bf16.mxu1 %v4009_v27  ;;  %v4024_v1 = vld [vmem:[#allocation8 + $0x100] sm:$0xff]   ;;  %v4030_v47 = vld [vmem:[#allocation8 + $0xa8] sm:$0xff]  }
 0x2f5   :  { %3527 = vmatprep.subr.bf16.mxu0 %v4011_v19 }
 0x2f6   :  { %2390 = vadd.xlane.f32.xlu1 %v2389_v15  ;;  %v2395_v28 = vadd.f32 %v2394_v17, %v2383_v16  ;;  %v74_v16 = vld [vmem:[#allocation7 + $0x1] ss:$4 sm:$0x3f] }
 0x2f7   :  { %3484 = vmatpush3.bf16.msra.mxu1 %v4010_v13  ;;  %v2422_v20 = vrot.slane %v74_v16, %v4275_v59  ;;  %v2438_v22 = vrot.slane %v74_v16, %v4304_v42  ;;  %v2430_v32 = vrot.slane %v74_v16, %v4279_v0  ;;  %v2434_v23 = vrot.slane %v74_v16, %v4284_v8 }
 0x2f8   :  { %v2396_v18 = vadd.f32 %v2395_v28, %v2384_v21  ;;  %3528 = vmatpush3.bf16.msra.mxu0 %v4012_v33  ;;  %3485 = vmatprep.subr.bf16.mxu1 %v4013_v30  ;;  %v76_v21 = vld [vmem:[#allocation7 + $0x2] ss:$4 sm:$0x3f]  ;;  %v2426_v28 = vrot.slane %v74_v16, %v4277_v62 }
 0x2f9   :  { %3529 = vmatprep.subr.bf16.mxu0 %v4015_v37  ;;  %v2511_v35 = vrot.slane %v76_v21, %v4277_v62  ;;  %v2527_v51 = vrot.slane %v76_v21, %v4308_v46  ;;  %v2523_v3 = vrot.slane %v76_v21, %v4304_v42  ;;  %v2507_v38 = vrot.slane %v76_v21, %v4275_v59 }
 0x2fa   :  { %2397 = vadd.xlane.f32.xlu1 %v2396_v18  ;;  %v2442_v18 = vrot.slane %v74_v16, %v4308_v46  ;;  %v2450_v41 = vpack.c.bf16 %v2426_v28, %v2426_v28  ;;  %v2515_v25 = vrot.slane %v76_v21, %v4279_v0  ;;  %v2449_v9 = vpack.c.bf16 %v2422_v20, %v2422_v20 }
 0x2fb   :  { %3486 = vmatpush3.bf16.msra.mxu1 %v4014_v36  ;;  %v2519_v52 = vrot.slane %v76_v21, %v4284_v8  ;;  %v2453_v27 = vpack.c.bf16 %v2438_v22, %v2438_v22  ;;  %v2535_v13 = vpack.c.bf16 %v2511_v35, %v2511_v35  ;;  %v2539_v62 = vpack.c.bf16 %v2527_v51, %v2527_v51 }
 0x2fc   :  { %3530 = vmatpush3.bf16.msra.mxu0 %v4016_v40  ;;  %3487 = vmatprep.subr.bf16.mxu1 %v4017_v43  ;;  %v2454_v26 = vpack.c.bf16 %v2442_v18, %v2442_v18  ;;  %v2451_v19 = vpack.c.bf16 %v2430_v32, %v2430_v32  ;;  %v2534_v46 = vpack.c.bf16 %v2507_v38, %v2507_v38 }
 0x2fd   :  { %3531 = vmatprep.subr.bf16.mxu0 %v4019_v55  ;;  %v2538_v33 = vpack.c.bf16 %v2523_v3, %v2523_v3  ;;  %v2452_v30 = vpack.c.bf16 %v2434_v23, %v2434_v23  ;;  %v2463_v36 = vpack.i.b16 %v2450_v41, %v2450_v41  ;;  %v2456_v37 = vpack.i.b16 %v2449_v9, %v2449_v9  ;;  %v4034_v9 = vld [vmem:[#allocation8 + $0x98] sm:$0xff]  }
 0x2fe   :  { %v2491_v42 = vpack.i.b16 %v2454_v26, %v2454_v26  ;;  %v2537_v40 = vpack.c.bf16 %v2519_v52, %v2519_v52  ;;  %v2536_v43 = vpack.c.bf16 %v2515_v25, %v2515_v25  ;;  %v2548_v55 = vpack.i.b16 %v2535_v13, %v2535_v13  ;;  %v4032_v25 = vld [vmem:[#allocation8 + $0xa0] sm:$0xff]   ;;  %v4033_v26 = vld [vmem:[#allocation8 + $0xd8] sm:$0xff]   ;;  %v4035_v52 = vld [vmem:[#allocation8 + $0xd0] sm:$0xff]  }
 0x2ff   :  { %3488 = vmatpush3.bf16.msra.mxu1 %v4018_v54  ;;  %v2484_v54 = vpack.i.b16 %v2453_v27, %v2453_v27  ;;  %v2470_v0 = vpack.i.b16 %v2451_v19, %v2451_v19  ;;  %v4036_v27 = vld [vmem:[#allocation8 + $0x90] sm:$0xff]   ;;  %v4037_v13 = vld [vmem:[#allocation8 + $0xc8] sm:$0xff]   ;;  %v4039_v19 = vld [vmem:[#allocation8 + $0xc0] sm:$0xff]  }
 0x300   :  { %3532 = vmatpush3.bf16.msra.mxu0 %v4020_v57  ;;  %3489 = vmatprep.subr.bf16.mxu1 %v4021_v56  ;;  %v2576_v57 = vpack.i.b16 %v2539_v62, %v2539_v62  ;;  %v2541_v56 = vpack.i.b16 %v2534_v46, %v2534_v46  ;;  %v2553_v16 = vrot.slane %v2548_v55, %v4275_v59  ;;  %v4038_v62 = vld [vmem:[#allocation8 + $0x88] sm:$0xff]   ;;  %v4040_v46 = vld [vmem:[#allocation8 + $0x80] sm:$0xff]  }
 0x301   :  { %3533 = vmatprep.subr.bf16.mxu0 %v4023_v58  ;;  %v2569_v58 = vpack.i.b16 %v2538_v33, %v2538_v33  ;;  %v2489_v21 = vrot.slane %v2484_v54, %v4275_v59  ;;  %v2475_v22 = vrot.slane %v2470_v0, %v4275_v59  ;;  %v3426_v54 = vld [vmem:[#allocation7 + $0x3] ss:$0 sm:$0xff] }
 0x302   :  { %v2546_v28 = vrot.slane %v2541_v56, %v4275_v59 }
 0x303   :  { %3490 = vmatpush3.bf16.msra.mxu1 %v4022_v60  ;;  %v2477_v60 = vpack.i.b16 %v2452_v30, %v2452_v30  ;;  %v2574_v18 = vrot.slane %v2569_v58, %v4275_v59 }
 0x304   :  { %3534 = vmatpush3.bf16.msra.mxu0 %v4024_v1  ;;  %3497 = vmatprep.subr.bf16.mxu1 %v4025_v2  ;;  %v2468_v1 = vrot.slane %v2463_v36, %v4275_v59 }
 0x305   :  { %v2482_v20 = vrot.slane %v2477_v60, %v4275_v59 }
 0x37f   :  { %v2391_v12 = vpop.xlane.xlu1 %2390 }
 0x380   :  { %v2399_v61 = vmul.f32 0.0013020834, %v2391_v12  ;;  %v2496_v12 = vrot.slane %v2491_v42, %v4275_v59 }
 0x382   :  { %v2401_v6 = vadd.f32 1e-05, %v2399_v61  ;;  %v2461_v61 = vrot.slane %v2456_v37, %v4275_v59 }
 0x383   :  { %v2398_v14 = vpop.xlane.xlu1 %2397 }
 0x384   :  { %v2400_v15 = vmul.f32 0.0013020834, %v2398_v14  ;;  %4089 = vrsqrt.f32 %v2401_v6  ;;  %v2562_v6 = vpack.i.b16 %v2537_v40, %v2537_v40  ;;  %v2555_v14 = vpack.i.b16 %v2536_v43, %v2536_v43 }
 0x386   :  { %v2402_v17 = vadd.f32 1e-05, %v2400_v15  ;;  %v2567_v23 = vrot.slane %v2562_v6, %v4275_v59  ;;  %v2560_v45 = vrot.slane %v2555_v14, %v4275_v59 }
 0x388   :  { %4091 = vrsqrt.f32 %v2402_v17  ;;  %v2581_v17 = vrot.slane %v2576_v57, %v4275_v59  ;;  %v4028_v59 = vld [vmem:[#allocation8 + $0xb0] sm:$0xff]  }
 0x391   :  { %v4090_v8 = vpop.eup %4089 }
 0x395   :  { %v4092_v2 = vpop.eup %4091 }
 0x396   :  { %v2411_v15 = vpack.c.bf16 %v4092_v2, %v4090_v8 }
 0x398   :  { %v2413_v35 = vmul.bf16 %v2411_v15, %v2406_v5  ;;  %v2417_v51 = vmul.bf16 %v2411_v15, %v2410_v4  ;;  %v2412_v32 = vmul.bf16 %v2411_v15, %v2405_v7  ;;  %v2416_v3 = vmul.bf16 %v2411_v15, %v2409_v63  ;;  %v4026_v7 = vld [vmem:[#allocation8 + $0xb8] sm:$0xff]  }
 0x399   :  { %v2415_v38 = vmul.bf16 %v2411_v15, %v2408_v10  ;;  %v2414_v31 = vmul.bf16 %v2411_v15, %v2407_v11  ;;  %v4031_v11 = vld [vmem:[#allocation8 + $0xe0] sm:$0xff]  }
 0x39a   :  { %v2498_v48 = vmul.bf16 %v2468_v1, %v2413_v35  ;;  %v2502_v53 = vmul.bf16 %v2496_v12, %v2417_v51  ;;  %v2497_v29 = vmul.bf16 %v2461_v61, %v2412_v32  ;;  %v2501_v44 = vmul.bf16 %v2489_v21, %v2416_v3 }
 0x39b   :  { %v2500_v4 = vmul.bf16 %v2482_v20, %v2415_v38  ;;  %v2499_v5 = vmul.bf16 %v2475_v22, %v2414_v31 }
 0x39c   :  { %v2583_v39 = vadd.bf16 %v2553_v16, %v2498_v48  ;;  %v2587_v50 = vadd.bf16 %v2581_v17, %v2502_v53  ;;  %v2582_v63 = vadd.bf16 %v2546_v28, %v2497_v29  ;;  %v2586_v34 = vadd.bf16 %v2574_v18, %v2501_v44 }
 0x39d   :  { %v2584_v10 = vadd.bf16 %v2560_v45, %v2499_v5  ;;  %v2585_v41 = vadd.bf16 %v2567_v23, %v2500_v4 }
 0x39e   :  { %3008 = vmatprep.mubr.bf16.mxu1 %v2583_v39  ;;  %3090 = vmatprep.mubr.bf16.mxu0 %v2587_v50 }
 0x39f   :  { %3009 = vmatmul.mubr.bf16.vlgmr.msra.gmra.mxu1 %v2582_v63  ;;  %3091 = vmatmul.mubr.bf16.vlgmr.msra.gmra.mxu0 %v2586_v34 }
 0x3a0   :  { %3498 = vmatpush3.bf16.msra.mxu1 %v4026_v7  ;;  %3049 = vmatprep.mubr.bf16.mxu1 %v2585_v41 }
 0x3a1   :  { %3499 = vmatprep.subr.bf16.mxu1 %v4027_v49 }
 0x3a4   :  { %3500 = vmatpush3.bf16.msra.mxu1 %v4028_v59 }
 0x3a5   :  { %3501 = vmatprep.subr.bf16.mxu1 %v4029_v24 }
 0x3a8   :  { %3502 = vmatpush3.bf16.msra.mxu1 %v4030_v47 }
 0x3a9   :  { %3503 = vmatprep.subr.bf16.mxu1 %v4031_v11 }
 0x3ac   :  { %3504 = vmatpush3.bf16.msra.mxu1 %v4032_v25 }
 0x3ad   :  { %3505 = vmatprep.subr.bf16.mxu1 %v4033_v26 }
 0x3b0   :  { %3506 = vmatpush3.bf16.msra.mxu1 %v4034_v9 }
 0x3b1   :  { %3507 = vmatprep.subr.bf16.mxu1 %v4035_v52 }
 0x3b4   :  { %3508 = vmatpush3.bf16.msra.mxu1 %v4036_v27 }
 0x3b5   :  { %3509 = vmatprep.subr.bf16.mxu1 %v4037_v13 }
 0x3b8   :  { %3510 = vmatpush3.bf16.msra.mxu1 %v4038_v62 }
 0x3b9   :  { %3511 = vmatprep.subr.bf16.mxu1 %v4039_v19 }
 0x3bc   :  { %3512 = vmatpush3.bf16.msra.mxu1 %v4040_v46 }
 0x3bf   :  { %3050 = vmatmul.mubr.bf16.vlgmr.msra.gmra.mxu1 %v2584_v10 }
 0x45f   :  { %v3491_v33 = vpop.f32.mrf.mxu1  ;;  %v3535_v36 = vpop.f32.mrf.mxu0 }
 0x461   :  { %v3492_v30 = vpop.f32.mrf.mxu1  ;;  %v3536_v37 = vpop.f32.mrf.mxu0 }
 0x462   :  { %v3493_v43 = vadd.f32 %v3492_v30, %v3491_v33  ;;  %v3537_v1 = vadd.f32 %v3536_v37, %v3535_v36 }
 0x463   :  { %v3494_v42 = vpop.f32.mrf.mxu1  ;;  %v3538_v57 = vpop.f32.mrf.mxu0 }
 0x464   :  { %v3011_v56 = vadd.f32 %v3493_v43, %v3426_v54 }
 0x465   :  { %v3495_v40 = vpop.f32.mrf.mxu1  ;;  %v3539_v12 = vpop.f32.mrf.mxu0 }
 0x466   :  { %v3496_v58 = vadd.f32 %v3495_v40, %v3494_v42  ;;  %v3540_v16 = vadd.f32 %v3539_v12, %v3538_v57 }
 0x468   :  { %v3014_v6 = vadd.f32 %v3496_v58, %v3426_v54 }
 0x47f   :  { %v3513_v55 = vpop.f32.mrf.mxu1 }
 0x481   :  { %v3514_v0 = vpop.f32.mrf.mxu1 }
 0x482   :  { %v3515_v60 = vadd.f32 %v3514_v0, %v3513_v55 }
 0x483   :  { %v3516_v8 = vpop.f32.mrf.mxu1 }
 0x484   :  { %v3052_v2 = vadd.f32 %v3515_v60, %v3011_v56 }
 0x485   :  { %v3517_v61 = vpop.f32.mrf.mxu1 }
 0x486   :  { %v3093_v14 = vadd.f32 %v3537_v1, %v3052_v2  ;;  %v3518_v15 = vadd.f32 %v3517_v61, %v3516_v8 }
 0x488   :  { %3099 = vst [vmem:[#allocation10] sm:$0xff] %v3093_v14  ;;  %v3055_v17 = vadd.f32 %v3518_v15, %v3014_v6 }
 0x48a   :  { %v3096_v21 = vadd.f32 %v3540_v16, %v3055_v17 }
 0x48c   :  { %3100 = vst [vmem:[#allocation10 + $0x8] sm:$0xff] %v3096_v21 }
 0x48d   :  { %4190 = shalt.err (!%p4187_p10)
}
 0x48e   :  { %s4216_s12 = smov 128   ;;  %s4217_s13 = smov 8  }
 0x48f   :  { %3112 = dma.vmem_to_hbm [thread:$0]  %s3107_s3, 256, %s4446_s4, [#allocation4], %s4216_s12, %s4216_s12, %s4217_s13  }
 0x490   :  { %4205 = dma.done.wait [#allocation4], 256  }
 0x491   :  { %4206 = vsyncadd [#allocation4], 4294967040 }
 0x492   :  { %3116 = vsyncpa [#allocation3], 1 }
 0x493   :  { %3117 = vsyncpa [#allocation6], 1 }
 0x494   :  { %3118 = vsyncpa [#allocation9], 1 }
 0x495   :  { %3119 = vsyncpa [#allocation4], 1 }

</bundles_post_ra>
